<compile_context>
chip_gen: v5e
topology: v5e:2x2
jax: 0.10.0
libtpu: 0.0.40
codegen_flags: <defaults>
</compile_context>

<pallas_src>
import jax
import jax.numpy as jnp
from jax.experimental import pallas as pl
from jax.experimental.pallas import tpu as pltpu

D_IN, D_H1, D_H2, D_OUT = 1024, 512, 128, 8
D_OUT_PAD = 128          # lane-dense output width (sliced back to 8 in the wrapper)
BN_EPS = 1e-5


def _round_up(n, m):
    return (n + m - 1) // m * m


def _choose_tb(bp, tb_max=512):
    """Batch tile: multiple of 16, divides bp, and (when possible) >= 2 grid steps
    so v7x's two TensorCores both get work (no-op on single-TC v5e/v6e)."""
    cap = tb_max
    if bp >= 32:
        cap = min(cap, bp // 2)
    cap = max(16, (cap // 16) * 16)
    tb = max(16, (min(cap, bp) // 16) * 16)
    while bp % tb != 0:     # bp is a multiple of 16, so this terminates at tb=16
        tb -= 16
    return tb


def head_kernel(x_ref, w1_ref, o1_ref, w2_ref, o2_ref, w3_ref, b3_ref, out_ref):
    # fc1 + bn1 (scale folded into w1, shift folded into o1) + relu.
    # x arrives f32; bf16 cast runs on the VPU right before the MXU (free filler).
    xb = x_ref[...].astype(jnp.bfloat16)
    h1 = jnp.dot(xb, w1_ref[...], preferred_element_type=jnp.float32)
    h1 = jnp.maximum(h1 + o1_ref[...], 0.0).astype(jnp.bfloat16)
    # fc2 + bn2 (folded) + relu
    h2 = jnp.dot(h1, w2_ref[...], preferred_element_type=jnp.float32)
    h2 = jnp.maximum(h2 + o2_ref[...], 0.0).astype(jnp.bfloat16)
    # fc3 (zero-padded to 128 output columns -> lane-dense unmasked stores)
    out = jnp.dot(h2, w3_ref[...], preferred_element_type=jnp.float32) + b3_ref[...]
    out_ref[...] = out.astype(out_ref.dtype)


def mobilenet_head(x, params, tb_max=512):
    """x: (B, 1024) f32 backbone features. Returns (B, 8) f32 logits."""
    w1f, o1, w2f, o2, w3p, b3p = params
    B = x.shape[0]

    # Minimal alignment pad only (multiple of 16), not up to a multiple of TB.
    Bp = _round_up(max(B, 1), 16)
    if Bp != B:
        x = jnp.pad(x, ((0, Bp - B), (0, 0)))

    TB = _choose_tb(Bp, tb_max)
    grid = (Bp // TB,)

    flops = 2 * Bp * (D_IN * D_H1 + D_H1 * D_H2 + D_H2 * D_OUT_PAD)
    bytes_accessed = int(
        Bp * D_IN * 4                                                   # f32 activations in
        + sum(int(a.size) * a.dtype.itemsize for a in params)           # weights/offsets
        + Bp * D_OUT_PAD * 2                                            # bf16 padded out
    )

    out = pl.pallas_call(
        head_kernel,
        out_shape=jax.ShapeDtypeStruct((Bp, D_OUT_PAD), jnp.bfloat16),
        grid=grid,
        in_specs=[
            pl.BlockSpec((TB, D_IN), lambda i: (i, 0)),        # x: tiled over batch (pipelined)
            pl.BlockSpec((D_IN, D_H1), lambda i: (0, 0)),      # weights: VMEM-resident
            pl.BlockSpec((1, D_H1), lambda i: (0, 0)),
            pl.BlockSpec((D_H1, D_H2), lambda i: (0, 0)),
            pl.BlockSpec((1, D_H2), lambda i: (0, 0)),
            pl.BlockSpec((D_H2, D_OUT_PAD), lambda i: (0, 0)),
            pl.BlockSpec((1, D_OUT_PAD), lambda i: (0, 0)),
        ],
        out_specs=pl.BlockSpec((TB, D_OUT_PAD), lambda i: (i, 0)),
        compiler_params=pltpu.CompilerParams(
            dimension_semantics=("parallel",)),
        cost_estimate=pl.CostEstimate(flops=flops, transcendentals=0,
                                      bytes_accessed=bytes_accessed),
    )(x, w1f, o1, w2f, o2, w3p, b3p)

    # Padded rows are zeros (no NaN risk); slice before any downstream reduction.
    return out[:B, :D_OUT].astype(jnp.float32)


def make_params(key):
    ks = jax.random.split(key, 14)

    def linear(kw, kb, fan_in, fan_out):
        bound = 1.0 / jnp.sqrt(fan_in)
        w = jax.random.uniform(kw, (fan_out, fan_in), jnp.float32, -bound, bound)
        b = jax.random.uniform(kb, (fan_out,), jnp.float32, -bound, bound)
        return w, b

    w1, b1 = linear(ks[0], ks[1], D_IN, D_H1)
    w2, b2 = linear(ks[2], ks[3], D_H1, D_H2)
    w3, b3 = linear(ks[4], ks[5], D_H2, D_OUT)

    # BatchNorm1d params (deterministic, non-trivial running stats)
    def bn(kg, kb, km, kv, n):
        gamma = 1.0 + 0.1 * jax.random.normal(kg, (n,), jnp.float32)
        beta = 0.1 * jax.random.normal(kb, (n,), jnp.float32)
        mean = 0.1 * jax.random.normal(km, (n,), jnp.float32)
        var = jnp.abs(1.0 + 0.1 * jax.random.normal(kv, (n,), jnp.float32))
        return gamma, beta, mean, var

    g1, be1, m1, v1 = bn(ks[6], ks[7], ks[8], ks[9], D_H1)
    g2, be2, m2, v2 = bn(ks[10], ks[11], ks[12], ks[13], D_H2)

    # Fold eval-mode BN into the preceding linear:
    #   bn(x @ W^T + b) = x @ (W^T * s) + ((b - m) * s + beta),  s = g / sqrt(v + eps)
    s1 = g1 / jnp.sqrt(v1 + BN_EPS)
    o1 = (b1 - m1) * s1 + be1
    s2 = g2 / jnp.sqrt(v2 + BN_EPS)
    o2 = (b2 - m2) * s2 + be2

    w1f = (w1.T * s1[None, :]).astype(jnp.bfloat16)   # (1024, 512)
    w2f = (w2.T * s2[None, :]).astype(jnp.bfloat16)   # (512, 128)

    # fc3 padded to 128 lane-dense output columns (zeros beyond D_OUT).
    w3p = jnp.zeros((D_H2, D_OUT_PAD), jnp.float32).at[:, :D_OUT].set(w3.T)
    w3p = w3p.astype(jnp.bfloat16)
    b3p = jnp.zeros((1, D_OUT_PAD), jnp.float32).at[:, :D_OUT].set(b3[None, :])

    kernel_params = (w1f, o1.reshape(1, -1), w2f, o2.reshape(1, -1), w3p, b3p)
    raw = (w1, b1, w2, b2, w3, b3, g1, be1, m1, v1, g2, be2, m2, v2)
    return kernel_params, raw


def reference_bf16(x, params):
    """Emulates the kernel's bf16-input / f32-accumulate / bf16-store math (tight check)."""
    w1f, o1, w2f, o2, w3p, b3p = params
    xb = x.astype(jnp.bfloat16)
    h1 = jnp.maximum(jnp.dot(xb, w1f, preferred_element_type=jnp.float32) + o1, 0.0)
    h1 = h1.astype(jnp.bfloat16)
    h2 = jnp.maximum(jnp.dot(h1, w2f, preferred_element_type=jnp.float32) + o2, 0.0)
    h2 = h2.astype(jnp.bfloat16)
    out = (jnp.dot(h2, w3p, preferred_element_type=jnp.float32) + b3p).astype(jnp.bfloat16)
    return out[:, :D_OUT].astype(jnp.float32)


def reference_f32(x, raw):
    """PyTorch eval-mode semantics in full f32 (loose check vs bf16 quantization)."""
    (w1, b1, w2, b2, w3, b3, g1, be1, m1, v1, g2, be2, m2, v2) = raw
    hp = jax.lax.Precision.HIGHEST

    def bn(h, g, be, m, v):
        return (h - m) * (g / jnp.sqrt(v + BN_EPS)) + be

    h1 = jnp.maximum(bn(jnp.dot(x, w1.T, precision=hp) + b1, g1, be1, m1, v1), 0.0)
    h2 = jnp.maximum(bn(jnp.dot(h1, w2.T, precision=hp) + b2, g2, be2, m2, v2), 0.0)
    return jnp.dot(h2, w3.T, precision=hp) + b3


if __name__ == "__main__":
    key = jax.random.PRNGKey(0)
    kx, kp = jax.random.split(key)
    params, raw = make_params(kp)

    # Small shape consistent with the module head: batch=2, 1024-dim features.
    B = 2
    x = jax.random.normal(kx, (B, D_IN), jnp.float32)
    out = mobilenet_head(x, params)
    jax.block_until_ready(out)
    assert out.shape == (B, D_OUT)

    # Tight check: kernel vs identical bf16-emulated math (tolerance covers one bf16 ULP at store).
    assert jnp.allclose(out, reference_bf16(x, params), atol=2e-2, rtol=2e-2)
    # Loose check: kernel vs full-f32 module semantics (difference = bf16 quantization only).
    assert jnp.allclose(out, reference_f32(x, raw), atol=6e-2, rtol=6e-2)

    # Also exercise the padded, multi-step (>=2 grid steps) tiling path.
    B2 = 50
    x2 = jax.random.normal(jax.random.PRNGKey(1), (B2, D_IN), jnp.float32)
    out2 = mobilenet_head(x2, params)
    jax.block_until_ready(out2)
    assert out2.shape == (B2, D_OUT)
    assert jnp.allclose(out2, reference_bf16(x2, params), atol=2e-2, rtol=2e-2)
    assert jnp.allclose(out2, reference_f32(x2, raw), atol=6e-2, rtol=6e-2)

    print("KERNEL_OK")
</pallas_src>

<mosaic_0001>
module attributes {stable_mosaic.version = 11 : i64} {
  func.func @head_kernel(%arg0: i32, %arg1: memref<16x1024xf32, #tpu.memory_space<vmem>>, %arg2: memref<1024x512xbf16, #tpu.memory_space<vmem>>, %arg3: memref<1x512xf32, #tpu.memory_space<vmem>>, %arg4: memref<512x128xbf16, #tpu.memory_space<vmem>>, %arg5: memref<1x128xf32, #tpu.memory_space<vmem>>, %arg6: memref<128x128xbf16, #tpu.memory_space<vmem>>, %arg7: memref<1x128xf32, #tpu.memory_space<vmem>>, %arg8: memref<16x128xbf16, #tpu.memory_space<vmem>>) attributes {dimension_semantics = [#tpu.dimension_semantics<parallel>], iteration_bounds = array<i64: 1>, scalar_prefetch = 0 : i64, scratch_operands = 0 : i64, tpu.core_type = #tpu.core_type<tc>, window_params = [{transform_indices = @transform_0, window_bounds = array<i64: 16, 1024>}, {pipeline_mode = #tpu.pipeline_mode<synchronous>, transform_indices = @transform_1, window_bounds = array<i64: 1024, 512>}, {pipeline_mode = #tpu.pipeline_mode<synchronous>, transform_indices = @transform_2, window_bounds = array<i64: 1, 512>}, {pipeline_mode = #tpu.pipeline_mode<synchronous>, transform_indices = @transform_3, window_bounds = array<i64: 512, 128>}, {pipeline_mode = #tpu.pipeline_mode<synchronous>, transform_indices = @transform_4, window_bounds = array<i64: 1, 128>}, {pipeline_mode = #tpu.pipeline_mode<synchronous>, transform_indices = @transform_5, window_bounds = array<i64: 128, 128>}, {pipeline_mode = #tpu.pipeline_mode<synchronous>, transform_indices = @transform_6, window_bounds = array<i64: 1, 128>}, {transform_indices = @transform_7, window_bounds = array<i64: 16, 128>}]} {
    %c0 = arith.constant 0 : index
    %c0_0 = arith.constant 0 : index
    %0 = vector.load %arg1[%c0, %c0_0] : memref<16x1024xf32, #tpu.memory_space<vmem>>, vector<16x1024xf32>
    %1 = arith.truncf %0 : vector<16x1024xf32> to vector<16x1024xbf16>
    %c0_1 = arith.constant 0 : index
    %c0_2 = arith.constant 0 : index
    %2 = vector.load %arg2[%c0_1, %c0_2] : memref<1024x512xbf16, #tpu.memory_space<vmem>>, vector<1024x512xbf16>
    %cst = arith.constant dense<0.000000e+00> : vector<16x512xf32>
    %3 = tpu.matmul %1, %2, %cst {dimension_numbers = #tpu.dot_dimension_numbers<[1], [0], [0], [1], [0, 0, 1, 1], [], []>} : vector<16x1024xbf16>, vector<1024x512xbf16>, vector<16x512xf32> -> vector<16x512xf32>
    %c0_3 = arith.constant 0 : index
    %c0_4 = arith.constant 0 : index
    %4 = vector.load %arg3[%c0_3, %c0_4] : memref<1x512xf32, #tpu.memory_space<vmem>>, vector<1x512xf32>
    %5 = vector.broadcast %4 : vector<1x512xf32> to vector<16x512xf32>
    %6 = arith.addf %3, %5 : vector<16x512xf32>
    %cst_5 = arith.constant 0.000000e+00 : f32
    %7 = vector.broadcast %cst_5 : f32 to vector<16x512xf32>
    %8 = arith.maximumf %6, %7 : vector<16x512xf32>
    %9 = arith.truncf %8 : vector<16x512xf32> to vector<16x512xbf16>
    %c0_6 = arith.constant 0 : index
    %c0_7 = arith.constant 0 : index
    %10 = vector.load %arg4[%c0_6, %c0_7] : memref<512x128xbf16, #tpu.memory_space<vmem>>, vector<512x128xbf16>
    %cst_8 = arith.constant dense<0.000000e+00> : vector<16x128xf32>
    %11 = tpu.matmul %9, %10, %cst_8 {dimension_numbers = #tpu.dot_dimension_numbers<[1], [0], [0], [1], [0, 0, 1, 1], [], []>} : vector<16x512xbf16>, vector<512x128xbf16>, vector<16x128xf32> -> vector<16x128xf32>
    %c0_9 = arith.constant 0 : index
    %c0_10 = arith.constant 0 : index
    %12 = vector.load %arg5[%c0_9, %c0_10] : memref<1x128xf32, #tpu.memory_space<vmem>>, vector<1x128xf32>
    %13 = vector.broadcast %12 : vector<1x128xf32> to vector<16x128xf32>
    %14 = arith.addf %11, %13 : vector<16x128xf32>
    %cst_11 = arith.constant 0.000000e+00 : f32
    %15 = vector.broadcast %cst_11 : f32 to vector<16x128xf32>
    %16 = arith.maximumf %14, %15 : vector<16x128xf32>
    %17 = arith.truncf %16 : vector<16x128xf32> to vector<16x128xbf16>
    %c0_12 = arith.constant 0 : index
    %c0_13 = arith.constant 0 : index
    %18 = vector.load %arg6[%c0_12, %c0_13] : memref<128x128xbf16, #tpu.memory_space<vmem>>, vector<128x128xbf16>
    %cst_14 = arith.constant dense<0.000000e+00> : vector<16x128xf32>
    %19 = tpu.matmul %17, %18, %cst_14 {dimension_numbers = #tpu.dot_dimension_numbers<[1], [0], [0], [1], [0, 0, 1, 1], [], []>} : vector<16x128xbf16>, vector<128x128xbf16>, vector<16x128xf32> -> vector<16x128xf32>
    %c0_15 = arith.constant 0 : index
    %c0_16 = arith.constant 0 : index
    %20 = vector.load %arg7[%c0_15, %c0_16] : memref<1x128xf32, #tpu.memory_space<vmem>>, vector<1x128xf32>
    %21 = vector.broadcast %20 : vector<1x128xf32> to vector<16x128xf32>
    %22 = arith.addf %19, %21 : vector<16x128xf32>
    %23 = arith.truncf %22 : vector<16x128xf32> to vector<16x128xbf16>
    %c0_17 = arith.constant 0 : index
    %c0_18 = arith.constant 0 : index
    %24 = vector.load %arg8[%c0_17, %c0_18] : memref<16x128xbf16, #tpu.memory_space<vmem>>, vector<16x128xbf16>
    tpu.vector_store %arg8[%c0_17, %c0_18], %23 {strides = array<i32>} : memref<16x128xbf16, #tpu.memory_space<vmem>>, vector<16x128xbf16>,
    return
  }
  func.func @transform_0(%arg0: i32) -> (i32, i32) {
    %c0_i32 = arith.constant 0 : i32
    %c0_i32_0 = arith.constant 0 : i32
    return %arg0, %c0_i32 : i32, i32
  }
  func.func @transform_1(%arg0: i32) -> (i32, i32) {
    %c0_i32 = arith.constant 0 : i32
    %c0_i32_0 = arith.constant 0 : i32
    %c0_i32_1 = arith.constant 0 : i32
    return %c0_i32, %c0_i32_0 : i32, i32
  }
  func.func @transform_2(%arg0: i32) -> (i32, i32) {
    %c0_i32 = arith.constant 0 : i32
    %c0_i32_0 = arith.constant 0 : i32
    %c0_i32_1 = arith.constant 0 : i32
    return %c0_i32, %c0_i32_0 : i32, i32
  }
  func.func @transform_3(%arg0: i32) -> (i32, i32) {
    %c0_i32 = arith.constant 0 : i32
    %c0_i32_0 = arith.constant 0 : i32
    %c0_i32_1 = arith.constant 0 : i32
    return %c0_i32, %c0_i32_0 : i32, i32
  }
  func.func @transform_4(%arg0: i32) -> (i32, i32) {
    %c0_i32 = arith.constant 0 : i32
    %c0_i32_0 = arith.constant 0 : i32
    %c0_i32_1 = arith.constant 0 : i32
    return %c0_i32, %c0_i32_0 : i32, i32
  }
  func.func @transform_5(%arg0: i32) -> (i32, i32) {
    %c0_i32 = arith.constant 0 : i32
    %c0_i32_0 = arith.constant 0 : i32
    %c0_i32_1 = arith.constant 0 : i32
    return %c0_i32, %c0_i32_0 : i32, i32
  }
  func.func @transform_6(%arg0: i32) -> (i32, i32) {
    %c0_i32 = arith.constant 0 : i32
    %c0_i32_0 = arith.constant 0 : i32
    %c0_i32_1 = arith.constant 0 : i32
    return %c0_i32, %c0_i32_0 : i32, i32
  }
  func.func @transform_7(%arg0: i32) -> (i32, i32) {
    %c0_i32 = arith.constant 0 : i32
    %c0_i32_0 = arith.constant 0 : i32
    return %arg0, %c0_i32 : i32, i32
  }
}

</mosaic_0001>

<bundles_post_ra>
// kernel: tpu_custom_call.1
= control target key start
LH: loop header
LB: loop body
LE: loop exit
PB: predicated region body
PF: predicated region fallthrough
CT: control target
= control target key end

     0   :  { %12 = vsyncpa [#allocation3], 0  ;;  %s4396_s0 = inlined_call_operand.hbm [shape: f32[16,1024], index: 0, kind: input, shape index: {}]   ;;  %s4397_s1 = inlined_call_operand.hbm [shape: bf16[1024,512], index: 1, kind: input, shape index: {}]   ;;  %s4398_s2 = inlined_call_operand.hbm [shape: f32[1,512], index: 2, kind: input, shape index: {}]   ;;  %s4399_s3 = inlined_call_operand.hbm [shape: bf16[512,128], index: 3, kind: input, shape index: {}]   ;;  %s4400_s4 = inlined_call_operand.vmem [shape: f32[1,128], index: 4, kind: input, shape index: {}]   ;;  %s4401_s5 = inlined_call_operand.hbm [shape: bf16[128,128], index: 5, kind: input, shape index: {}]   ;;  %s4402_s6 = inlined_call_operand.vmem [shape: f32[1,128], index: 6, kind: input, shape index: {}]   ;;  %s4403_s7 = inlined_call_operand.hbm [shape: bf16[16,128], index: 7, kind: output, shape index: {}]  }
   0x1   :  { %13 = vsyncpa [#allocation6], 0 }
   0x2   :  { %14 = vsyncpa [#allocation9], 0  ;;  %s33_s26 = sshll.u32 %s4397_s1, 4  ;;  %s34_s26 = int_to_ptr.hbm [resolvable:$true] %s33_s26 }
   0x3   :  { %15 = vsyncpa [#allocation4], 0  ;;  %s4209_s27 = smov [#allocation5]   ;;  %s4210_s29 = smov 256  }
   0x4   :  { %s35_s28 = sshll.u32 %s4209_s27, 4  ;;  %s4211_s30 = smov 16   ;;  %s36_s28 = int_to_ptr.vmem [resolvable:$true] %s35_s28 }
   0x5   :  { %41 = dma.hbm_to_vmem [thread:$0]  %s34_s26, 32768, %s36_s28, [#allocation6], %s4210_s29, %s4210_s29, %s4211_s30  }
   0x6   :  { %s57_s10 = sshll.u32 %s4399_s3, 4  ;;  %s4212_s11 = smov [#allocation8]   ;;  %s58_s10 = int_to_ptr.hbm [resolvable:$true] %s57_s10 }
   0x7   :  { %s59_s12 = sshll.u32 %s4212_s11, 4  ;;  %s4213_s13 = smov 64   ;;  %s60_s12 = int_to_ptr.vmem [resolvable:$true] %s59_s12 }
   0x8   :  { %s4214_s14 = smov 4   ;;  %s20_s16 = sshll.u32 %s4396_s0, 4  ;;  %s21_s16 = int_to_ptr.hbm [resolvable:$true] %s20_s16 }
   0x9   :  { %65 = dma.hbm_to_vmem [thread:$0]  %s58_s10, 4096, %s60_s12, [#allocation9], %s4213_s13, %s4213_s13, %s4214_s14  }
   0xa   :  { %s4215_s17 = smov [#allocation2]   ;;  %s4216_s19 = smov 1024  }
   0xb   :  { %s22_s18 = sshll.u32 %s4215_s17, 4  ;;  %s47_s21 = sshll.u32 %s4398_s2, 4  ;;  %s23_s18 = int_to_ptr.vmem [resolvable:$true] %s22_s18  ;;  %s48_s21 = int_to_ptr.hbm [resolvable:$true] %s47_s21 }
   0xc   :  { %28 = dma.hbm_to_vmem [thread:$0]  %s21_s16, 2048, %s23_s18, [#allocation3], %s4216_s19, %s4216_s19, %s4213_s13  }
   0xd   :  { %s4217_s22 = smov [#allocation7]   ;;  %s72_s26 = sshll.u32 %s4401_s5, 4  ;;  %s73_s26 = int_to_ptr.hbm [resolvable:$true] %s72_s26 }
   0xe   :  { %s49_s23 = sshll.u32 %s4217_s22, 4  ;;  %s4218_s0 = smov [#allocation10]   ;;  %s50_s23 = int_to_ptr.vmem [resolvable:$true] %s49_s23 }
   0xf   :  { %52 = dma.hbm_to_vmem [thread:$0]  %s48_s21, 64, %s50_s23, [#allocation6]  }
  0x10   :  { %s74_s27 = sshll.u32 %s4218_s0, 4  ;;  %s75_s27 = int_to_ptr.vmem [resolvable:$true] %s74_s27 }
  0x11   :  { %80 = dma.hbm_to_vmem [thread:$0]  %s73_s26, 1024, %s75_s27, [#allocation9], %s4213_s13, %s4213_s13, %s4214_s14  }
  0x12   :  { %4201 = dma.done.wait [#allocation3], 2048  }
  0x13   :  { %4202 = vsyncadd [#allocation3], 4294965248 }
  0x14   :  { %4203 = dma.done.wait [#allocation6], 32832  }
  0x15   :  { %4204 = vsyncadd [#allocation6], 4294934464 }
  0x16   :  { %4205 = dma.done.wait [#allocation9], 5120  }
  0x17   :  { %4206 = vsyncadd [#allocation9], 4294962176  ;;  %v2673_v0 = vld [vmem:[#allocation5 + $0xe0] sm:$0xf]  ;;  %v3773_v1 = vld [vmem:[#allocation5 + $0xec] sm:$0xf0] }
  0x18   :  { %v2801_v2 = vld [vmem:[#allocation5 + $0x1e0] sm:$0xf]  ;;  %v2674_v3 = vor.u32 %v3773_v1, %v2673_v0  ;;  %v3805_v4 = vld [vmem:[#allocation5 + $0x1ec] sm:$0xf0]  ;;  %s4219_s29 = smov [#allocation11]   ;;  %s2544_s10 = sshll.u32 %s4403_s7, 4  ;;  %s2545_s10 = int_to_ptr.hbm [resolvable:$true] %s2544_s10 }
  0x19   :  { %v2929_v5 = vld [vmem:[#allocation5 + $0x2e0] sm:$0xf]  ;;  %v3837_v6 = vld [vmem:[#allocation5 + $0x2ec] sm:$0xf0]  ;;  %v2802_v7 = vor.u32 %v3805_v4, %v2801_v2  ;;  %s2542_s30 = sshll.u32 %s4219_s29, 4  ;;  %s2543_s30 = int_to_ptr.vmem [resolvable:$true] %s2542_s30 }
  0x1a   :  { %v2930_v8 = vor.u32 %v3837_v6, %v2929_v5  ;;  %v3057_v9 = vld [vmem:[#allocation5 + $0x3e0] sm:$0xf]  ;;  %v3869_v10 = vld [vmem:[#allocation5 + $0x3ec] sm:$0xf0]  ;;  %1673 = vmatpush.bf16.msra.mxu0 %v2674_v3 }
  0x1b   :  { %v2657_v11 = vld [vmem:[#allocation5 + $0xc0] sm:$0xf]  ;;  %v3058_v12 = vor.u32 %v3869_v10, %v3057_v9  ;;  %v3769_v13 = vld [vmem:[#allocation5 + $0xcc] sm:$0xf0]  ;;  %1687 = vmatpush.bf16.msra.mxu1 %v2802_v7 }
  0x1c   :  { %v2785_v14 = vld [vmem:[#allocation5 + $0x1c0] sm:$0xf]  ;;  %v3801_v15 = vld [vmem:[#allocation5 + $0x1cc] sm:$0xf0]  ;;  %1701 = vmatpush.bf16.msra.mxu2 %v2930_v8  ;;  %v2658_v16 = vor.u32 %v3769_v13, %v2657_v11 }
  0x1d   :  { %v2786_v17 = vor.u32 %v3801_v15, %v2785_v14  ;;  %v2913_v18 = vld [vmem:[#allocation5 + $0x2c0] sm:$0xf]  ;;  %v3833_v19 = vld [vmem:[#allocation5 + $0x2cc] sm:$0xf0]  ;;  %1715 = vmatpush.bf16.msra.mxu3 %v3058_v12 }
  0x1e   :  { %v3041_v20 = vld [vmem:[#allocation5 + $0x3c0] sm:$0xf]  ;;  %v2914_v21 = vor.u32 %v3833_v19, %v2913_v18  ;;  %v3865_v22 = vld [vmem:[#allocation5 + $0x3cc] sm:$0xf0]  ;;  %1674 = vmatpush.bf16.msra.mxu0 %v2658_v16 }
  0x1f   :  { %v2641_v23 = vld [vmem:[#allocation5 + $0xa0] sm:$0xf]  ;;  %v3765_v24 = vld [vmem:[#allocation5 + $0xac] sm:$0xf0]  ;;  %v3042_v25 = vor.u32 %v3865_v22, %v3041_v20  ;;  %1688 = vmatpush.bf16.msra.mxu1 %v2786_v17 }
  0x20   :  { %v2769_v26 = vld [vmem:[#allocation5 + $0x1a0] sm:$0xf]  ;;  %v3797_v27 = vld [vmem:[#allocation5 + $0x1ac] sm:$0xf0]  ;;  %v2642_v29 = vor.u32 %v3765_v24, %v2641_v23  ;;  %1702 = vmatpush.bf16.msra.mxu2 %v2914_v21 }
  0x21   :  { %v2897_v28 = vld [vmem:[#allocation5 + $0x2a0] sm:$0xf]  ;;  %v3829_v30 = vld [vmem:[#allocation5 + $0x2ac] sm:$0xf0]  ;;  %v2770_v33 = vor.u32 %v3797_v27, %v2769_v26  ;;  %1716 = vmatpush.bf16.msra.mxu3 %v3042_v25 }
  0x22   :  { %v3025_v31 = vld [vmem:[#allocation5 + $0x3a0] sm:$0xf]  ;;  %v3861_v32 = vld [vmem:[#allocation5 + $0x3ac] sm:$0xf0]  ;;  %v2898_v34 = vor.u32 %v3829_v30, %v2897_v28  ;;  %1675 = vmatpush.bf16.msra.mxu0 %v2642_v29 }
  0x23   :  { %v2625_v35 = vld [vmem:[#allocation5 + $0x80] sm:$0xf]  ;;  %v3761_v36 = vld [vmem:[#allocation5 + $0x8c] sm:$0xf0]  ;;  %v3026_v38 = vor.u32 %v3861_v32, %v3025_v31  ;;  %1689 = vmatpush.bf16.msra.mxu1 %v2770_v33 }
  0x24   :  { %v2753_v37 = vld [vmem:[#allocation5 + $0x180] sm:$0xf]  ;;  %v3793_v39 = vld [vmem:[#allocation5 + $0x18c] sm:$0xf0]  ;;  %v2626_v44 = vor.u32 %v3761_v36, %v2625_v35  ;;  %1703 = vmatpush.bf16.msra.mxu2 %v2898_v34 }
  0x25   :  { %v2881_v40 = vld [vmem:[#allocation5 + $0x280] sm:$0xf]  ;;  %v3825_v41 = vld [vmem:[#allocation5 + $0x28c] sm:$0xf0]  ;;  %v2754_v45 = vor.u32 %v3793_v39, %v2753_v37  ;;  %1717 = vmatpush.bf16.msra.mxu3 %v3026_v38 }
  0x26   :  { %v3009_v42 = vld [vmem:[#allocation5 + $0x380] sm:$0xf]  ;;  %v3857_v43 = vld [vmem:[#allocation5 + $0x38c] sm:$0xf0]  ;;  %v2882_v46 = vor.u32 %v3825_v41, %v2881_v40  ;;  %1676 = vmatpush.bf16.msra.mxu0 %v2626_v44 }
  0x27   :  { %v2609_v47 = vld [vmem:[#allocation5 + $0x60] sm:$0xf]  ;;  %v3757_v48 = vld [vmem:[#allocation5 + $0x6c] sm:$0xf0]  ;;  %v3010_v50 = vor.u32 %v3857_v43, %v3009_v42  ;;  %1690 = vmatpush.bf16.msra.mxu1 %v2754_v45 }
  0x28   :  { %v2737_v49 = vld [vmem:[#allocation5 + $0x160] sm:$0xf]  ;;  %v3789_v51 = vld [vmem:[#allocation5 + $0x16c] sm:$0xf0]  ;;  %v2610_v56 = vor.u32 %v3757_v48, %v2609_v47  ;;  %1704 = vmatpush.bf16.msra.mxu2 %v2882_v46 }
  0x29   :  { %v2865_v52 = vld [vmem:[#allocation5 + $0x260] sm:$0xf]  ;;  %v3821_v53 = vld [vmem:[#allocation5 + $0x26c] sm:$0xf0]  ;;  %v2738_v57 = vor.u32 %v3789_v51, %v2737_v49  ;;  %1718 = vmatpush.bf16.msra.mxu3 %v3010_v50 }
  0x2a   :  { %v2993_v54 = vld [vmem:[#allocation5 + $0x360] sm:$0xf]  ;;  %v3853_v55 = vld [vmem:[#allocation5 + $0x36c] sm:$0xf0]  ;;  %v2866_v58 = vor.u32 %v3821_v53, %v2865_v52  ;;  %1677 = vmatpush.bf16.msra.mxu0 %v2610_v56 }
  0x2b   :  { %v2593_v59 = vld [vmem:[#allocation5 + $0x40] sm:$0xf]  ;;  %v3753_v60 = vld [vmem:[#allocation5 + $0x4c] sm:$0xf0]  ;;  %v2994_v62 = vor.u32 %v3853_v55, %v2993_v54  ;;  %1691 = vmatpush.bf16.msra.mxu1 %v2738_v57 }
  0x2c   :  { %v2721_v61 = vld [vmem:[#allocation5 + $0x140] sm:$0xf]  ;;  %v3785_v63 = vld [vmem:[#allocation5 + $0x14c] sm:$0xf0]  ;;  %v2594_v4 = vor.u32 %v3753_v60, %v2593_v59  ;;  %1705 = vmatpush.bf16.msra.mxu2 %v2866_v58 }
  0x2d   :  { %v2849_v0 = vld [vmem:[#allocation5 + $0x240] sm:$0xf]  ;;  %v3817_v1 = vld [vmem:[#allocation5 + $0x24c] sm:$0xf0]  ;;  %v2722_v5 = vor.u32 %v3785_v63, %v2721_v61  ;;  %1719 = vmatpush.bf16.msra.mxu3 %v2994_v62 }
  0x2e   :  { %v2977_v2 = vld [vmem:[#allocation5 + $0x340] sm:$0xf]  ;;  %v3849_v3 = vld [vmem:[#allocation5 + $0x34c] sm:$0xf0]  ;;  %v2850_v6 = vor.u32 %v3817_v1, %v2849_v0  ;;  %1678 = vmatpush.bf16.msra.mxu0 %v2594_v4 }
  0x2f   :  { %v2577_v7 = vld [vmem:[#allocation5 + $0x20] sm:$0xf]  ;;  %v3749_v8 = vld [vmem:[#allocation5 + $0x2c] sm:$0xf0]  ;;  %v2978_v10 = vor.u32 %v3849_v3, %v2977_v2  ;;  %1692 = vmatpush.bf16.msra.mxu1 %v2722_v5 }
  0x30   :  { %v2705_v9 = vld [vmem:[#allocation5 + $0x120] sm:$0xf]  ;;  %v3781_v11 = vld [vmem:[#allocation5 + $0x12c] sm:$0xf0]  ;;  %v2578_v16 = vor.u32 %v3749_v8, %v2577_v7  ;;  %1706 = vmatpush.bf16.msra.mxu2 %v2850_v6  ;;  %v104_v6 = vld [vmem:[#allocation2 + $0x8] sm:$0xff] }
  0x31   :  { %v2833_v12 = vld [vmem:[#allocation5 + $0x220] sm:$0xf]  ;;  %v3813_v13 = vld [vmem:[#allocation5 + $0x22c] sm:$0xf0]  ;;  %v2706_v19 = vor.u32 %v3781_v11, %v2705_v9  ;;  %1720 = vmatpush.bf16.msra.mxu3 %v2978_v10  ;;  %v112_v7 = vld [vmem:[#allocation2 + $0x48] sm:$0xff] }
  0x32   :  { %v2961_v14 = vld [vmem:[#allocation5 + $0x320] sm:$0xf]  ;;  %v3845_v15 = vld [vmem:[#allocation5 + $0x32c] sm:$0xf0]  ;;  %v2834_v20 = vor.u32 %v3813_v13, %v2833_v12  ;;  %1679 = vmatpush.bf16.msra.mxu0 %v2578_v16  ;;  %v106_v8 = vld [vmem:[#allocation2 + $0x18] sm:$0xff]  ;;  %v4288_v10 = vpack.c.bf16 %v112_v7, %v104_v6 }
  0x33   :  { %v2561_v17 = vld [vmem:[#allocation5] sm:$0xf]  ;;  %v3745_v18 = vld [vmem:[#allocation5 + $0xc] sm:$0xf0]  ;;  %v2962_v24 = vor.u32 %v3845_v15, %v2961_v14  ;;  %1693 = vmatpush.bf16.msra.mxu1 %v2706_v19  ;;  %v114_v11 = vld [vmem:[#allocation2 + $0x58] sm:$0xff] }
  0x34   :  { %v2689_v21 = vld [vmem:[#allocation5 + $0x100] sm:$0xf]  ;;  %v3777_v22 = vld [vmem:[#allocation5 + $0x10c] sm:$0xf0]  ;;  %v2562_v31 = vor.u32 %v3745_v18, %v2561_v17  ;;  %1707 = vmatpush.bf16.msra.mxu2 %v2834_v20  ;;  %v4290_v17 = vpack.c.bf16 %v114_v11, %v106_v8 }
  0x35   :  { %v2817_v23 = vld [vmem:[#allocation5 + $0x200] sm:$0xf]  ;;  %v3809_v25 = vld [vmem:[#allocation5 + $0x20c] sm:$0xf0]  ;;  %v2690_v35 = vor.u32 %v3777_v22, %v2689_v21  ;;  %1721 = vmatpush.bf16.msra.mxu3 %v2962_v24 }
  0x36   :  { %v2945_v26 = vld [vmem:[#allocation5 + $0x300] sm:$0xf]  ;;  %v3841_v27 = vld [vmem:[#allocation5 + $0x30c] sm:$0xf0]  ;;  %v2818_v36 = vor.u32 %v3809_v25, %v2817_v23  ;;  %1680 = vmatpush.bf16.msra.mxu0 %v2562_v31 }
  0x37   :  { %v3185_v28 = vld [vmem:[#allocation5 + $0x4e0] sm:$0xf]  ;;  %v3901_v29 = vld [vmem:[#allocation5 + $0x4ec] sm:$0xf0]  ;;  %v2946_v39 = vor.u32 %v3841_v27, %v2945_v26  ;;  %1694 = vmatpush.bf16.msra.mxu1 %v2690_v35 }
  0x38   :  { %v3313_v30 = vld [vmem:[#allocation5 + $0x5e0] sm:$0xf]  ;;  %v3933_v32 = vld [vmem:[#allocation5 + $0x5ec] sm:$0xf0]  ;;  %v3186_v40 = vor.u32 %v3901_v29, %v3185_v28  ;;  %1708 = vmatpush.bf16.msra.mxu2 %v2818_v36 }
  0x39   :  { %v3441_v33 = vld [vmem:[#allocation5 + $0x6e0] sm:$0xf]  ;;  %v3965_v34 = vld [vmem:[#allocation5 + $0x6ec] sm:$0xf0]  ;;  %v3314_v43 = vor.u32 %v3933_v32, %v3313_v30  ;;  %1722 = vmatpush.bf16.msra.mxu3 %v2946_v39 }
  0x3a   :  { %v3569_v37 = vld [vmem:[#allocation5 + $0x7e0] sm:$0xf]  ;;  %v3997_v38 = vld [vmem:[#allocation5 + $0x7ec] sm:$0xf0]  ;;  %v3442_v44 = vor.u32 %v3965_v34, %v3441_v33  ;;  %1729 = vmatpush.bf16.msrb.mxu0 %v3186_v40  ;;  %1695 = vmatmul.bf16.vlgmr.msra.gmra.mxu1 %v4288_v10 }
  0x3b   :  { %v3169_v41 = vld [vmem:[#allocation5 + $0x4c0] sm:$0xf]  ;;  %v3897_v42 = vld [vmem:[#allocation5 + $0x4cc] sm:$0xf0]  ;;  %v3570_v48 = vor.u32 %v3997_v38, %v3569_v37  ;;  %1743 = vmatpush.bf16.msrb.mxu1 %v3314_v43 }
  0x3c   :  { %v3297_v45 = vld [vmem:[#allocation5 + $0x5c0] sm:$0xf]  ;;  %v3929_v46 = vld [vmem:[#allocation5 + $0x5cc] sm:$0xf0]  ;;  %v3170_v55 = vor.u32 %v3897_v42, %v3169_v41  ;;  %1757 = vmatpush.bf16.msrb.mxu2 %v3442_v44  ;;  %1723 = vmatmul.bf16.vlgmr.msra.gmra.mxu3 %v4290_v17 }
  0x3d   :  { %v3425_v47 = vld [vmem:[#allocation5 + $0x6c0] sm:$0xf]  ;;  %v3961_v49 = vld [vmem:[#allocation5 + $0x6cc] sm:$0xf0]  ;;  %v3298_v60 = vor.u32 %v3929_v46, %v3297_v45  ;;  %1771 = vmatpush.bf16.msrb.mxu3 %v3570_v48 }
  0x3e   :  { %v3553_v50 = vld [vmem:[#allocation5 + $0x7c0] sm:$0xf]  ;;  %v3993_v51 = vld [vmem:[#allocation5 + $0x7cc] sm:$0xf0]  ;;  %v3426_v61 = vor.u32 %v3961_v49, %v3425_v47  ;;  %1730 = vmatpush.bf16.msrb.mxu0 %v3170_v55 }
  0x3f   :  { %v103_v52 = vld [vmem:[#allocation2] sm:$0xff]  ;;  %v105_v54 = vld [vmem:[#allocation2 + $0x10] sm:$0xff]  ;;  %v3554_v2 = vor.u32 %v3993_v51, %v3553_v50  ;;  %1744 = vmatpush.bf16.msrb.mxu1 %v3298_v60 }
  0x40   :  { %v111_v53 = vld [vmem:[#allocation2 + $0x40] sm:$0xff]  ;;  %v3893_v57 = vld [vmem:[#allocation5 + $0x4ac] sm:$0xf0]  ;;  %1758 = vmatpush.bf16.msrb.mxu2 %v3426_v61 }
  0x41   :  { %v3153_v56 = vld [vmem:[#allocation5 + $0x4a0] sm:$0xf]  ;;  %v4282_v58 = vpack.c.bf16 %v111_v53, %v103_v52  ;;  %v113_v59 = vld [vmem:[#allocation2 + $0x50] sm:$0xff]  ;;  %1772 = vmatpush.bf16.msrb.mxu3 %v3554_v2 }
  0x42   :  { %v3281_v62 = vld [vmem:[#allocation5 + $0x5a0] sm:$0xf]  ;;  %v3925_v63 = vld [vmem:[#allocation5 + $0x5ac] sm:$0xf0]  ;;  %v4284_v1 = vpack.c.bf16 %v113_v59, %v105_v54  ;;  %v3154_v9 = vor.u32 %v3893_v57, %v3153_v56 }
  0x43   :  { %v3409_v0 = vld [vmem:[#allocation5 + $0x6a0] sm:$0xf]  ;;  %v3957_v3 = vld [vmem:[#allocation5 + $0x6ac] sm:$0xf0]  ;;  %1681 = vmatmul.bf16.vlgmr.msra.gmra.mxu0 %v4282_v58  ;;  %v3282_v12 = vor.u32 %v3925_v63, %v3281_v62 }
  0x44   :  { %v3537_v4 = vld [vmem:[#allocation5 + $0x7a0] sm:$0xf]  ;;  %v3989_v5 = vld [vmem:[#allocation5 + $0x7ac] sm:$0xf0]  ;;  %1709 = vmatmul.bf16.vlgmr.msra.gmra.mxu2 %v4284_v1  ;;  %v3410_v13 = vor.u32 %v3957_v3, %v3409_v0  ;;  %1731 = vmatpush.bf16.msrb.mxu0 %v3154_v9  ;;  %v3771_v9 = vld [vmem:[#allocation5 + $0xe4] sm:$0xf] }
  0x45   :  { %v3137_v14 = vld [vmem:[#allocation5 + $0x480] sm:$0xf]  ;;  %v3889_v15 = vld [vmem:[#allocation5 + $0x48c] sm:$0xf0]  ;;  %v3538_v18 = vor.u32 %v3989_v5, %v3537_v4  ;;  %1745 = vmatpush.bf16.msrb.mxu1 %v3282_v12  ;;  %v2675_v12 = vld [vmem:[#allocation5 + $0xf0] sm:$0xf0] }
  0x46   :  { %v3265_v16 = vld [vmem:[#allocation5 + $0x580] sm:$0xf]  ;;  %v3921_v19 = vld [vmem:[#allocation5 + $0x58c] sm:$0xf0]  ;;  %v3138_v24 = vor.u32 %v3889_v15, %v3137_v14  ;;  %1759 = vmatpush.bf16.msrb.mxu2 %v3410_v13  ;;  %v3803_v13 = vld [vmem:[#allocation5 + $0x1e4] sm:$0xf] }
  0x47   :  { %v3393_v20 = vld [vmem:[#allocation5 + $0x680] sm:$0xf]  ;;  %v3953_v21 = vld [vmem:[#allocation5 + $0x68c] sm:$0xf0]  ;;  %v3266_v25 = vor.u32 %v3921_v19, %v3265_v16  ;;  %1773 = vmatpush.bf16.msrb.mxu3 %v3538_v18  ;;  %v2803_v14 = vld [vmem:[#allocation5 + $0x1f0] sm:$0xf0] }
  0x48   :  { %v3521_v22 = vld [vmem:[#allocation5 + $0x780] sm:$0xf]  ;;  %v3985_v23 = vld [vmem:[#allocation5 + $0x78c] sm:$0xf0]  ;;  %v3394_v26 = vor.u32 %v3953_v21, %v3393_v20  ;;  %1732 = vmatpush.bf16.msrb.mxu0 %v3138_v24  ;;  %v3835_v15 = vld [vmem:[#allocation5 + $0x2e4] sm:$0xf] }
  0x49   :  { %v3121_v27 = vld [vmem:[#allocation5 + $0x460] sm:$0xf]  ;;  %v3885_v28 = vld [vmem:[#allocation5 + $0x46c] sm:$0xf0]  ;;  %v3522_v30 = vor.u32 %v3985_v23, %v3521_v22  ;;  %1746 = vmatpush.bf16.msrb.mxu1 %v3266_v25  ;;  %v2931_v16 = vld [vmem:[#allocation5 + $0x2f0] sm:$0xf0] }
  0x4a   :  { %v3249_v29 = vld [vmem:[#allocation5 + $0x560] sm:$0xf]  ;;  %v3917_v31 = vld [vmem:[#allocation5 + $0x56c] sm:$0xf0]  ;;  %v3122_v36 = vor.u32 %v3885_v28, %v3121_v27  ;;  %1760 = vmatpush.bf16.msrb.mxu2 %v3394_v26  ;;  %v3867_v18 = vld [vmem:[#allocation5 + $0x3e4] sm:$0xf] }
  0x4b   :  { %v3377_v32 = vld [vmem:[#allocation5 + $0x660] sm:$0xf]  ;;  %v3949_v33 = vld [vmem:[#allocation5 + $0x66c] sm:$0xf0]  ;;  %v3250_v37 = vor.u32 %v3917_v31, %v3249_v29  ;;  %1774 = vmatpush.bf16.msrb.mxu3 %v3522_v30  ;;  %v3059_v20 = vld [vmem:[#allocation5 + $0x3f0] sm:$0xf0]  ;;  %v2678_v29 = vor.u32 %v3771_v9, %v2675_v12 }
  0x4c   :  { %v3505_v34 = vld [vmem:[#allocation5 + $0x760] sm:$0xf]  ;;  %v3981_v35 = vld [vmem:[#allocation5 + $0x76c] sm:$0xf0]  ;;  %v3378_v38 = vor.u32 %v3949_v33, %v3377_v32  ;;  %1733 = vmatpush.bf16.msrb.mxu0 %v3122_v36  ;;  %v108_v27 = vld [vmem:[#allocation2 + $0x28] sm:$0xff]  ;;  %v2806_v33 = vor.u32 %v3803_v13, %v2803_v14 }
  0x4d   :  { %v3105_v39 = vld [vmem:[#allocation5 + $0x440] sm:$0xf]  ;;  %v3881_v40 = vld [vmem:[#allocation5 + $0x44c] sm:$0xf0]  ;;  %v3506_v42 = vor.u32 %v3981_v35, %v3505_v34  ;;  %1747 = vmatpush.bf16.msrb.mxu1 %v3250_v37  ;;  %v116_v30 = vld [vmem:[#allocation2 + $0x68] sm:$0xff]  ;;  %v2934_v34 = vor.u32 %v3835_v15, %v2931_v16 }
  0x4e   :  { %v3233_v41 = vld [vmem:[#allocation5 + $0x540] sm:$0xf]  ;;  %v3913_v43 = vld [vmem:[#allocation5 + $0x54c] sm:$0xf0]  ;;  %v3106_v48 = vor.u32 %v3881_v40, %v3105_v39  ;;  %1761 = vmatpush.bf16.msrb.mxu2 %v3378_v38  ;;  %v110_v31 = vld [vmem:[#allocation2 + $0x38] sm:$0xff]  ;;  %v3062_v38 = vor.u32 %v3867_v18, %v3059_v20 }
  0x4f   :  { %v3361_v44 = vld [vmem:[#allocation5 + $0x640] sm:$0xf]  ;;  %v3945_v45 = vld [vmem:[#allocation5 + $0x64c] sm:$0xf0]  ;;  %v3234_v50 = vor.u32 %v3913_v43, %v3233_v41  ;;  %1775 = vmatpush.bf16.msrb.mxu3 %v3506_v42  ;;  %v118_v32 = vld [vmem:[#allocation2 + $0x78] sm:$0xff] }
  0x50   :  { %v3489_v46 = vld [vmem:[#allocation5 + $0x740] sm:$0xf]  ;;  %v3977_v47 = vld [vmem:[#allocation5 + $0x74c] sm:$0xf0]  ;;  %v3362_v51 = vor.u32 %v3945_v45, %v3361_v44  ;;  %1734 = vmatpush.bf16.msrb.mxu0 %v3106_v48  ;;  %v3767_v35 = vld [vmem:[#allocation5 + $0xc4] sm:$0xf]  ;;  %v4298_v44 = vpack.c.bf16 %v116_v30, %v108_v27 }
  0x51   :  { %v3089_v49 = vld [vmem:[#allocation5 + $0x420] sm:$0xf]  ;;  %v3877_v52 = vld [vmem:[#allocation5 + $0x42c] sm:$0xf0]  ;;  %v3490_v55 = vor.u32 %v3977_v47, %v3489_v46  ;;  %1748 = vmatpush.bf16.msrb.mxu1 %v3234_v50  ;;  %v2659_v36 = vld [vmem:[#allocation5 + $0xd0] sm:$0xf0]  ;;  %v4300_v47 = vpack.c.bf16 %v118_v32, %v110_v31 }
  0x52   :  { %v3217_v53 = vld [vmem:[#allocation5 + $0x520] sm:$0xf]  ;;  %v3909_v54 = vld [vmem:[#allocation5 + $0x52c] sm:$0xf0]  ;;  %v3090_v63 = vor.u32 %v3877_v52, %v3089_v49  ;;  %1762 = vmatpush.bf16.msrb.mxu2 %v3362_v51  ;;  %v3799_v37 = vld [vmem:[#allocation5 + $0x1c4] sm:$0xf]  ;;  %v2662_v48 = vor.u32 %v3767_v35, %v2659_v36 }
  0x53   :  { %v3345_v56 = vld [vmem:[#allocation5 + $0x620] sm:$0xf]  ;;  %v3941_v57 = vld [vmem:[#allocation5 + $0x62c] sm:$0xf0]  ;;  %v3218_v5 = vor.u32 %v3909_v54, %v3217_v53  ;;  %1776 = vmatpush.bf16.msrb.mxu3 %v3490_v55  ;;  %v2787_v40 = vld [vmem:[#allocation5 + $0x1d0] sm:$0xf0] }
  0x54   :  { %v3473_v59 = vld [vmem:[#allocation5 + $0x720] sm:$0xf]  ;;  %v3973_v60 = vld [vmem:[#allocation5 + $0x72c] sm:$0xf0]  ;;  %v3346_v6 = vor.u32 %v3941_v57, %v3345_v56  ;;  %1735 = vmatpush.bf16.msrb.mxu0 %v3090_v63  ;;  %v3831_v41 = vld [vmem:[#allocation5 + $0x2c4] sm:$0xf]  ;;  %v2790_v49 = vor.u32 %v3799_v37, %v2787_v40 }
  0x55   :  { %v3073_v61 = vld [vmem:[#allocation5 + $0x400] sm:$0xf]  ;;  %v3873_v62 = vld [vmem:[#allocation5 + $0x40c] sm:$0xf0]  ;;  %v3474_v11 = vor.u32 %v3973_v60, %v3473_v59  ;;  %1749 = vmatpush.bf16.msrb.mxu1 %v3218_v5  ;;  %v2915_v42 = vld [vmem:[#allocation5 + $0x2d0] sm:$0xf0] }
  0x56   :  { %v3201_v0 = vld [vmem:[#allocation5 + $0x500] sm:$0xf]  ;;  %v3905_v2 = vld [vmem:[#allocation5 + $0x50c] sm:$0xf0]  ;;  %v3074_v19 = vor.u32 %v3873_v62, %v3073_v61  ;;  %1763 = vmatpush.bf16.msrb.mxu2 %v3346_v6  ;;  %v3863_v45 = vld [vmem:[#allocation5 + $0x3c4] sm:$0xf]  ;;  %v2918_v50 = vor.u32 %v3831_v41, %v2915_v42 }
  0x57   :  { %v3329_v3 = vld [vmem:[#allocation5 + $0x600] sm:$0xf]  ;;  %v3937_v4 = vld [vmem:[#allocation5 + $0x60c] sm:$0xf0]  ;;  %v3202_v23 = vor.u32 %v3905_v2, %v3201_v0  ;;  %1777 = vmatpush.bf16.msrb.mxu3 %v3474_v11  ;;  %v3043_v46 = vld [vmem:[#allocation5 + $0x3d0] sm:$0xf0] }
  0x58   :  { %v3457_v7 = vld [vmem:[#allocation5 + $0x700] sm:$0xf]  ;;  %v3969_v8 = vld [vmem:[#allocation5 + $0x70c] sm:$0xf0]  ;;  %v3330_v24 = vor.u32 %v3937_v4, %v3329_v3  ;;  %1736 = vmatpush.bf16.msrb.mxu0 %v3074_v19  ;;  %v3763_v51 = vld [vmem:[#allocation5 + $0xa4] sm:$0xf]  ;;  %v3046_v54 = vor.u32 %v3863_v45, %v3043_v46 }
  0x59   :  { %v107_v21 = vld [vmem:[#allocation2 + $0x20] sm:$0xff]  ;;  %v109_v25 = vld [vmem:[#allocation2 + $0x30] sm:$0xff]  ;;  %v3458_v28 = vor.u32 %v3969_v8, %v3457_v7  ;;  %1750 = vmatpush.bf16.msrb.mxu1 %v3202_v23 }
  0x5a   :  { %v115_v22 = vld [vmem:[#allocation2 + $0x60] sm:$0xff]  ;;  %v117_v26 = vld [vmem:[#allocation2 + $0x70] sm:$0xff]  ;;  %1764 = vmatpush.bf16.msrb.mxu2 %v3330_v24 }
  0x5b   :  { %v4294_v39 = vpack.c.bf16 %v115_v22, %v107_v21  ;;  %v4296_v43 = vpack.c.bf16 %v117_v26, %v109_v25  ;;  %1778 = vmatpush.bf16.msrb.mxu3 %v3458_v28  ;;  %v2643_v52 = vld [vmem:[#allocation5 + $0xb0] sm:$0xf0]  ;;  %v3795_v53 = vld [vmem:[#allocation5 + $0x1a4] sm:$0xf] }
  0x5c   :  { %1785 = vmatpush.bf16.msra.mxu0 %v2678_v29  ;;  %v2771_v55 = vld [vmem:[#allocation5 + $0x1b0] sm:$0xf0]  ;;  %v3827_v56 = vld [vmem:[#allocation5 + $0x2a4] sm:$0xf]  ;;  %1751 = vmatmul.bf16.vlgmr.msrb.gmra.mxu1 %v4298_v44  ;;  %v2646_v61 = vor.u32 %v3763_v51, %v2643_v52 }
  0x5d   :  { %1799 = vmatpush.bf16.msra.mxu1 %v2806_v33  ;;  %1737 = vmatmul.bf16.vlgmr.msrb.gmra.mxu0 %v4294_v39  ;;  %v2899_v57 = vld [vmem:[#allocation5 + $0x2b0] sm:$0xf0]  ;;  %v3859_v59 = vld [vmem:[#allocation5 + $0x3a4] sm:$0xf]  ;;  %v2774_v62 = vor.u32 %v3795_v53, %v2771_v55 }
  0x5e   :  { %1813 = vmatpush.bf16.msra.mxu2 %v2934_v34  ;;  %v3027_v60 = vld [vmem:[#allocation5 + $0x3b0] sm:$0xf0]  ;;  %1779 = vmatmul.bf16.vlgmr.msrb.gmra.mxu3 %v4300_v47  ;;  %v2902_v63 = vor.u32 %v3827_v56, %v2899_v57  ;;  %v3759_v0 = vld [vmem:[#allocation5 + $0x84] sm:$0xf] }
  0x5f   :  { %1827 = vmatpush.bf16.msra.mxu3 %v3062_v38  ;;  %1765 = vmatmul.bf16.vlgmr.msrb.gmra.mxu2 %v4296_v43  ;;  %v2627_v2 = vld [vmem:[#allocation5 + $0x90] sm:$0xf0]  ;;  %v3791_v3 = vld [vmem:[#allocation5 + $0x184] sm:$0xf]  ;;  %v3030_v4 = vor.u32 %v3859_v59, %v3027_v60 }
  0x60   :  { %1786 = vmatpush.bf16.msra.mxu0 %v2662_v48  ;;  %v2755_v5 = vld [vmem:[#allocation5 + $0x190] sm:$0xf0]  ;;  %v3823_v6 = vld [vmem:[#allocation5 + $0x284] sm:$0xf]  ;;  %v2630_v11 = vor.u32 %v3759_v0, %v2627_v2 }
  0x61   :  { %1800 = vmatpush.bf16.msra.mxu1 %v2790_v49  ;;  %v2883_v7 = vld [vmem:[#allocation5 + $0x290] sm:$0xf0]  ;;  %v3855_v8 = vld [vmem:[#allocation5 + $0x384] sm:$0xf]  ;;  %v2758_v12 = vor.u32 %v3791_v3, %v2755_v5 }
  0x62   :  { %1814 = vmatpush.bf16.msra.mxu2 %v2918_v50  ;;  %v3011_v9 = vld [vmem:[#allocation5 + $0x390] sm:$0xf0]  ;;  %v2886_v13 = vor.u32 %v3823_v6, %v2883_v7  ;;  %v3755_v14 = vld [vmem:[#allocation5 + $0x64] sm:$0xf] }
  0x63   :  { %1828 = vmatpush.bf16.msra.mxu3 %v3046_v54  ;;  %v2611_v15 = vld [vmem:[#allocation5 + $0x70] sm:$0xf0]  ;;  %v3787_v16 = vld [vmem:[#allocation5 + $0x164] sm:$0xf]  ;;  %v3014_v18 = vor.u32 %v3855_v8, %v3011_v9 }
  0x64   :  { %1787 = vmatpush.bf16.msra.mxu0 %v2646_v61  ;;  %v2739_v19 = vld [vmem:[#allocation5 + $0x170] sm:$0xf0]  ;;  %v3819_v20 = vld [vmem:[#allocation5 + $0x264] sm:$0xf]  ;;  %v2614_v24 = vor.u32 %v3755_v14, %v2611_v15 }
  0x65   :  { %1801 = vmatpush.bf16.msra.mxu1 %v2774_v62  ;;  %v2867_v21 = vld [vmem:[#allocation5 + $0x270] sm:$0xf0]  ;;  %v3851_v22 = vld [vmem:[#allocation5 + $0x364] sm:$0xf]  ;;  %v2742_v25 = vor.u32 %v3787_v16, %v2739_v19 }
  0x66   :  { %1815 = vmatpush.bf16.msra.mxu2 %v2902_v63  ;;  %v2995_v23 = vld [vmem:[#allocation5 + $0x370] sm:$0xf0]  ;;  %v2870_v26 = vor.u32 %v3819_v20, %v2867_v21  ;;  %v3751_v27 = vld [vmem:[#allocation5 + $0x44] sm:$0xf] }
  0x67   :  { %1829 = vmatpush.bf16.msra.mxu3 %v3030_v4  ;;  %v2595_v28 = vld [vmem:[#allocation5 + $0x50] sm:$0xf0]  ;;  %v3783_v29 = vld [vmem:[#allocation5 + $0x144] sm:$0xf]  ;;  %v2998_v30 = vor.u32 %v3851_v22, %v2995_v23 }
  0x68   :  { %1788 = vmatpush.bf16.msra.mxu0 %v2630_v11  ;;  %v2723_v31 = vld [vmem:[#allocation5 + $0x150] sm:$0xf0]  ;;  %v3815_v32 = vld [vmem:[#allocation5 + $0x244] sm:$0xf]  ;;  %v2598_v36 = vor.u32 %v3751_v27, %v2595_v28 }
  0x69   :  { %1802 = vmatpush.bf16.msra.mxu1 %v2758_v12  ;;  %v2851_v33 = vld [vmem:[#allocation5 + $0x250] sm:$0xf0]  ;;  %v3847_v34 = vld [vmem:[#allocation5 + $0x344] sm:$0xf]  ;;  %v2726_v37 = vor.u32 %v3783_v29, %v2723_v31 }
  0x6a   :  { %1816 = vmatpush.bf16.msra.mxu2 %v2886_v13  ;;  %v2979_v35 = vld [vmem:[#allocation5 + $0x350] sm:$0xf0]  ;;  %v2854_v38 = vor.u32 %v3815_v32, %v2851_v33  ;;  %v3747_v40 = vld [vmem:[#allocation5 + $0x24] sm:$0xf] }
  0x6b   :  { %1830 = vmatpush.bf16.msra.mxu3 %v3014_v18  ;;  %v2579_v41 = vld [vmem:[#allocation5 + $0x30] sm:$0xf0]  ;;  %v3779_v42 = vld [vmem:[#allocation5 + $0x124] sm:$0xf]  ;;  %v2982_v45 = vor.u32 %v3847_v34, %v2979_v35 }
  0x6c   :  { %1789 = vmatpush.bf16.msra.mxu0 %v2614_v24  ;;  %v2707_v46 = vld [vmem:[#allocation5 + $0x130] sm:$0xf0]  ;;  %v3811_v48 = vld [vmem:[#allocation5 + $0x224] sm:$0xf]  ;;  %v2582_v52 = vor.u32 %v3747_v40, %v2579_v41 }
  0x6d   :  { %1803 = vmatpush.bf16.msra.mxu1 %v2742_v25  ;;  %v2835_v49 = vld [vmem:[#allocation5 + $0x230] sm:$0xf0]  ;;  %v3843_v50 = vld [vmem:[#allocation5 + $0x324] sm:$0xf]  ;;  %v2710_v55 = vor.u32 %v3779_v42, %v2707_v46 }
  0x6e   :  { %1817 = vmatpush.bf16.msra.mxu2 %v2870_v26  ;;  %v2963_v51 = vld [vmem:[#allocation5 + $0x330] sm:$0xf0]  ;;  %v3743_v53 = vld [vmem:[#allocation5 + $0x4] sm:$0xf]  ;;  %v2838_v56 = vor.u32 %v3811_v48, %v2835_v49 }
  0x6f   :  { %1831 = vmatpush.bf16.msra.mxu3 %v2998_v30  ;;  %v2563_v54 = vld [vmem:[#allocation5 + $0x10] sm:$0xf0]  ;;  %v3775_v57 = vld [vmem:[#allocation5 + $0x104] sm:$0xf]  ;;  %v2966_v61 = vor.u32 %v3843_v50, %v2963_v51 }
  0x70   :  { %1790 = vmatpush.bf16.msra.mxu0 %v2598_v36  ;;  %v2691_v59 = vld [vmem:[#allocation5 + $0x110] sm:$0xf0]  ;;  %v3807_v60 = vld [vmem:[#allocation5 + $0x204] sm:$0xf]  ;;  %v2566_v5 = vor.u32 %v3743_v53, %v2563_v54 }
  0x71   :  { %1804 = vmatpush.bf16.msra.mxu1 %v2726_v37  ;;  %v2819_v62 = vld [vmem:[#allocation5 + $0x210] sm:$0xf0]  ;;  %v3839_v63 = vld [vmem:[#allocation5 + $0x304] sm:$0xf]  ;;  %v2694_v9 = vor.u32 %v3775_v57, %v2691_v59 }
  0x72   :  { %1818 = vmatpush.bf16.msra.mxu2 %v2854_v38  ;;  %v2947_v0 = vld [vmem:[#allocation5 + $0x310] sm:$0xf0]  ;;  %v3899_v2 = vld [vmem:[#allocation5 + $0x4e4] sm:$0xf]  ;;  %v2822_v11 = vor.u32 %v3807_v60, %v2819_v62 }
  0x73   :  { %1832 = vmatpush.bf16.msra.mxu3 %v2982_v45  ;;  %v3187_v3 = vld [vmem:[#allocation5 + $0x4f0] sm:$0xf0]  ;;  %v3931_v4 = vld [vmem:[#allocation5 + $0x5e4] sm:$0xf]  ;;  %v2950_v14 = vor.u32 %v3839_v63, %v2947_v0 }
  0x74   :  { %1791 = vmatpush.bf16.msra.mxu0 %v2582_v52  ;;  %v3315_v6 = vld [vmem:[#allocation5 + $0x5f0] sm:$0xf0]  ;;  %v3963_v7 = vld [vmem:[#allocation5 + $0x6e4] sm:$0xf]  ;;  %v3190_v15 = vor.u32 %v3899_v2, %v3187_v3 }
  0x75   :  { %v3443_v8 = vld [vmem:[#allocation5 + $0x6f0] sm:$0xf0]  ;;  %1805 = vmatpush.bf16.msra.mxu1 %v2710_v55  ;;  %v3995_v12 = vld [vmem:[#allocation5 + $0x7e4] sm:$0xf]  ;;  %v3318_v16 = vor.u32 %v3931_v4, %v3315_v6 }
  0x76   :  { %1819 = vmatpush.bf16.msra.mxu2 %v2838_v56  ;;  %v3571_v13 = vld [vmem:[#allocation5 + $0x7f0] sm:$0xf0]  ;;  %v3446_v18 = vor.u32 %v3963_v7, %v3443_v8  ;;  %v3895_v19 = vld [vmem:[#allocation5 + $0x4c4] sm:$0xf] }
  0x77   :  { %1833 = vmatpush.bf16.msra.mxu3 %v2966_v61  ;;  %v3171_v20 = vld [vmem:[#allocation5 + $0x4d0] sm:$0xf0]  ;;  %v3927_v21 = vld [vmem:[#allocation5 + $0x5c4] sm:$0xf]  ;;  %v3574_v22 = vor.u32 %v3995_v12, %v3571_v13 }
  0x78   :  { %1792 = vmatpush.bf16.msra.mxu0 %v2566_v5  ;;  %v3299_v23 = vld [vmem:[#allocation5 + $0x5d0] sm:$0xf0]  ;;  %v3959_v24 = vld [vmem:[#allocation5 + $0x6c4] sm:$0xf]  ;;  %v3174_v28 = vor.u32 %v3895_v19, %v3171_v20 }
  0x79   :  { %v3427_v25 = vld [vmem:[#allocation5 + $0x6d0] sm:$0xf0]  ;;  %1806 = vmatpush.bf16.msra.mxu1 %v2694_v9  ;;  %v3991_v26 = vld [vmem:[#allocation5 + $0x7c4] sm:$0xf]  ;;  %v3302_v29 = vor.u32 %v3927_v21, %v3299_v23 }
  0x7a   :  { %1820 = vmatpush.bf16.msra.mxu2 %v2822_v11  ;;  %v3555_v27 = vld [vmem:[#allocation5 + $0x7d0] sm:$0xf0]  ;;  %v3430_v30 = vor.u32 %v3959_v24, %v3427_v25  ;;  %v3891_v31 = vld [vmem:[#allocation5 + $0x4a4] sm:$0xf] }
  0x7b   :  { %1834 = vmatpush.bf16.msra.mxu3 %v2950_v14  ;;  %v3155_v32 = vld [vmem:[#allocation5 + $0x4b0] sm:$0xf0]  ;;  %v3923_v33 = vld [vmem:[#allocation5 + $0x5a4] sm:$0xf]  ;;  %v3558_v34 = vor.u32 %v3991_v26, %v3555_v27  ;;  %1793 = vmatmul.bf16.vlgmr.msra.gmra.mxu0 %v4282_v58 }
  0x7c   :  { %1841 = vmatpush.bf16.msrb.mxu0 %v3190_v15  ;;  %v3283_v35 = vld [vmem:[#allocation5 + $0x5b0] sm:$0xf0]  ;;  %v3955_v36 = vld [vmem:[#allocation5 + $0x6a4] sm:$0xf]  ;;  %1807 = vmatmul.bf16.vlgmr.msra.gmra.mxu1 %v4288_v10  ;;  %v3158_v41 = vor.u32 %v3891_v31, %v3155_v32 }
  0x7d   :  { %1855 = vmatpush.bf16.msrb.mxu1 %v3318_v16  ;;  %v3411_v37 = vld [vmem:[#allocation5 + $0x6b0] sm:$0xf0]  ;;  %v3987_v38 = vld [vmem:[#allocation5 + $0x7a4] sm:$0xf]  ;;  %1821 = vmatmul.bf16.vlgmr.msra.gmra.mxu2 %v4284_v1  ;;  %v3286_v42 = vor.u32 %v3923_v33, %v3283_v35 }
  0x7e   :  { %1869 = vmatpush.bf16.msrb.mxu2 %v3446_v18  ;;  %v3539_v40 = vld [vmem:[#allocation5 + $0x7b0] sm:$0xf0]  ;;  %1835 = vmatmul.bf16.vlgmr.msra.gmra.mxu3 %v4290_v17  ;;  %v3414_v45 = vor.u32 %v3955_v36, %v3411_v37  ;;  %v3887_v46 = vld [vmem:[#allocation5 + $0x484] sm:$0xf] }
  0x7f   :  { %1883 = vmatpush.bf16.msrb.mxu3 %v3574_v22  ;;  %v3139_v48 = vld [vmem:[#allocation5 + $0x490] sm:$0xf0]  ;;  %v3919_v49 = vld [vmem:[#allocation5 + $0x584] sm:$0xf]  ;;  %v3542_v50 = vor.u32 %v3987_v38, %v3539_v40 }
  0x80   :  { %1842 = vmatpush.bf16.msrb.mxu0 %v3174_v28  ;;  %v3267_v51 = vld [vmem:[#allocation5 + $0x590] sm:$0xf0]  ;;  %v3951_v52 = vld [vmem:[#allocation5 + $0x684] sm:$0xf]  ;;  %v3142_v56 = vor.u32 %v3887_v46, %v3139_v48  ;;  %v2681_v48 = vld [vmem:[#allocation5 + $0xe8] sm:$0xf] }
  0x81   :  { %1856 = vmatpush.bf16.msrb.mxu1 %v3302_v29  ;;  %v3395_v53 = vld [vmem:[#allocation5 + $0x690] sm:$0xf0]  ;;  %v3983_v54 = vld [vmem:[#allocation5 + $0x784] sm:$0xf]  ;;  %v3270_v57 = vor.u32 %v3919_v49, %v3267_v51  ;;  %v3774_v49 = vld [vmem:[#allocation5 + $0xf4] sm:$0xf0] }
  0x82   :  { %1870 = vmatpush.bf16.msrb.mxu2 %v3430_v30  ;;  %v3523_v55 = vld [vmem:[#allocation5 + $0x790] sm:$0xf0]  ;;  %v3398_v59 = vor.u32 %v3951_v52, %v3395_v53  ;;  %v3883_v60 = vld [vmem:[#allocation5 + $0x464] sm:$0xf]  ;;  %v3806_v52 = vld [vmem:[#allocation5 + $0x1f4] sm:$0xf0] }
  0x83   :  { %1884 = vmatpush.bf16.msrb.mxu3 %v3558_v34  ;;  %v3123_v61 = vld [vmem:[#allocation5 + $0x470] sm:$0xf0]  ;;  %v3915_v62 = vld [vmem:[#allocation5 + $0x564] sm:$0xf]  ;;  %v3526_v63 = vor.u32 %v3983_v54, %v3523_v55  ;;  %v2937_v53 = vld [vmem:[#allocation5 + $0x2e8] sm:$0xf] }
  0x84   :  { %1843 = vmatpush.bf16.msrb.mxu0 %v3158_v41  ;;  %v3251_v0 = vld [vmem:[#allocation5 + $0x570] sm:$0xf0]  ;;  %v3947_v2 = vld [vmem:[#allocation5 + $0x664] sm:$0xf]  ;;  %v3126_v6 = vor.u32 %v3883_v60, %v3123_v61  ;;  %v3838_v54 = vld [vmem:[#allocation5 + $0x2f4] sm:$0xf0]  ;;  %v2682_v61 = vor.u32 %v3774_v49, %v2681_v48 }
  0x85   :  { %1857 = vmatpush.bf16.msrb.mxu1 %v3286_v42  ;;  %v3379_v3 = vld [vmem:[#allocation5 + $0x670] sm:$0xf0]  ;;  %v3979_v4 = vld [vmem:[#allocation5 + $0x764] sm:$0xf]  ;;  %v3254_v7 = vor.u32 %v3915_v62, %v3251_v0  ;;  %v2665_v0 = vld [vmem:[#allocation5 + $0xc8] sm:$0xf] }
  0x86   :  { %1871 = vmatpush.bf16.msrb.mxu2 %v3414_v45  ;;  %v3507_v5 = vld [vmem:[#allocation5 + $0x770] sm:$0xf0]  ;;  %v3382_v8 = vor.u32 %v3947_v2, %v3379_v3  ;;  %v3879_v9 = vld [vmem:[#allocation5 + $0x444] sm:$0xf]  ;;  %v3770_v2 = vld [vmem:[#allocation5 + $0xd4] sm:$0xf0] }
  0x87   :  { %1885 = vmatpush.bf16.msrb.mxu3 %v3542_v50  ;;  %v3107_v11 = vld [vmem:[#allocation5 + $0x450] sm:$0xf0]  ;;  %v3911_v12 = vld [vmem:[#allocation5 + $0x544] sm:$0xf]  ;;  %v3510_v13 = vor.u32 %v3979_v4, %v3507_v5  ;;  %v2809_v50 = vld [vmem:[#allocation5 + $0x1e8] sm:$0xf] }
  0x88   :  { %1844 = vmatpush.bf16.msrb.mxu0 %v3142_v56  ;;  %v3235_v14 = vld [vmem:[#allocation5 + $0x550] sm:$0xf0]  ;;  %v3943_v15 = vld [vmem:[#allocation5 + $0x644] sm:$0xf]  ;;  %v3110_v20 = vor.u32 %v3879_v9, %v3107_v11  ;;  %v2810_v62 = vor.u32 %v3806_v52, %v2809_v50  ;;  %v2793_v3 = vld [vmem:[#allocation5 + $0x1c8] sm:$0xf]  ;;  %v2666_v11 = vor.u32 %v3770_v2, %v2665_v0 }
  0x89   :  { %1858 = vmatpush.bf16.msrb.mxu1 %v3270_v57  ;;  %v3363_v16 = vld [vmem:[#allocation5 + $0x650] sm:$0xf0]  ;;  %v3975_v18 = vld [vmem:[#allocation5 + $0x744] sm:$0xf]  ;;  %v3238_v21 = vor.u32 %v3911_v12, %v3235_v14  ;;  %v3065_v57 = vld [vmem:[#allocation5 + $0x3e8] sm:$0xf] }
  0x8a   :  { %1872 = vmatpush.bf16.msrb.mxu2 %v3398_v59  ;;  %v3491_v19 = vld [vmem:[#allocation5 + $0x750] sm:$0xf0]  ;;  %v3366_v22 = vor.u32 %v3943_v15, %v3363_v16  ;;  %v3875_v23 = vld [vmem:[#allocation5 + $0x424] sm:$0xf]  ;;  %v3870_v59 = vld [vmem:[#allocation5 + $0x3f4] sm:$0xf0] }
  0x8b   :  { %1886 = vmatpush.bf16.msrb.mxu3 %v3526_v63  ;;  %v3091_v24 = vld [vmem:[#allocation5 + $0x430] sm:$0xf0]  ;;  %v3907_v25 = vld [vmem:[#allocation5 + $0x524] sm:$0xf]  ;;  %v3494_v26 = vor.u32 %v3975_v18, %v3491_v19  ;;  %v2938_v63 = vor.u32 %v3838_v54, %v2937_v53  ;;  %v3066_v4 = vor.u32 %v3870_v59, %v3065_v57  ;;  %v3802_v5 = vld [vmem:[#allocation5 + $0x1d4] sm:$0xf0] }
  0x8c   :  { %1845 = vmatpush.bf16.msrb.mxu0 %v3126_v6  ;;  %v3219_v27 = vld [vmem:[#allocation5 + $0x530] sm:$0xf0]  ;;  %v3939_v28 = vld [vmem:[#allocation5 + $0x624] sm:$0xf]  ;;  %v3094_v32 = vor.u32 %v3875_v23, %v3091_v24  ;;  %v2921_v6 = vld [vmem:[#allocation5 + $0x2c8] sm:$0xf]  ;;  %v2794_v12 = vor.u32 %v3802_v5, %v2793_v3 }
  0x8d   :  { %1859 = vmatpush.bf16.msrb.mxu1 %v3254_v7  ;;  %v3347_v29 = vld [vmem:[#allocation5 + $0x630] sm:$0xf0]  ;;  %v3971_v30 = vld [vmem:[#allocation5 + $0x724] sm:$0xf]  ;;  %v3222_v35 = vor.u32 %v3907_v25, %v3219_v27  ;;  %v3834_v7 = vld [vmem:[#allocation5 + $0x2d4] sm:$0xf0] }
  0x8e   :  { %1873 = vmatpush.bf16.msrb.mxu2 %v3382_v8  ;;  %v3475_v31 = vld [vmem:[#allocation5 + $0x730] sm:$0xf0]  ;;  %v3871_v33 = vld [vmem:[#allocation5 + $0x404] sm:$0xf]  ;;  %v3350_v36 = vor.u32 %v3939_v28, %v3347_v29  ;;  %v3049_v8 = vld [vmem:[#allocation5 + $0x3c8] sm:$0xf] }
  0x8f   :  { %1887 = vmatpush.bf16.msrb.mxu3 %v3510_v13  ;;  %v3075_v34 = vld [vmem:[#allocation5 + $0x410] sm:$0xf0]  ;;  %v3903_v37 = vld [vmem:[#allocation5 + $0x504] sm:$0xf]  ;;  %v3478_v41 = vor.u32 %v3971_v30, %v3475_v31  ;;  %v3866_v9 = vld [vmem:[#allocation5 + $0x3d4] sm:$0xf0]  ;;  %v2922_v13 = vor.u32 %v3834_v7, %v2921_v6 }
  0x90   :  { %1846 = vmatpush.bf16.msrb.mxu0 %v3110_v20  ;;  %v3203_v38 = vld [vmem:[#allocation5 + $0x510] sm:$0xf0]  ;;  %v3935_v40 = vld [vmem:[#allocation5 + $0x604] sm:$0xf]  ;;  %v3078_v51 = vor.u32 %v3871_v33, %v3075_v34  ;;  %v2649_v14 = vld [vmem:[#allocation5 + $0xa8] sm:$0xf]  ;;  %v3050_v18 = vor.u32 %v3866_v9, %v3049_v8 }
  0x91   :  { %1860 = vmatpush.bf16.msrb.mxu1 %v3238_v21  ;;  %v3331_v42 = vld [vmem:[#allocation5 + $0x610] sm:$0xf0]  ;;  %v3967_v45 = vld [vmem:[#allocation5 + $0x704] sm:$0xf]  ;;  %v3206_v55 = vor.u32 %v3903_v37, %v3203_v38  ;;  %v3766_v15 = vld [vmem:[#allocation5 + $0xb4] sm:$0xf0] }
  0x92   :  { %1874 = vmatpush.bf16.msrb.mxu2 %v3366_v22  ;;  %v3459_v46 = vld [vmem:[#allocation5 + $0x710] sm:$0xf0]  ;;  %v3334_v56 = vor.u32 %v3935_v40, %v3331_v42  ;;  %v2777_v16 = vld [vmem:[#allocation5 + $0x1a8] sm:$0xf]  ;;  %v3798_v19 = vld [vmem:[#allocation5 + $0x1b4] sm:$0xf0]  ;;  %v2650_v24 = vor.u32 %v3766_v15, %v2649_v14 }
  0x93   :  { %1888 = vmatpush.bf16.msrb.mxu3 %v3494_v26  ;;  %v3462_v60 = vor.u32 %v3967_v45, %v3459_v46  ;;  %v2905_v20 = vld [vmem:[#allocation5 + $0x2a8] sm:$0xf]  ;;  %v3830_v21 = vld [vmem:[#allocation5 + $0x2b4] sm:$0xf0]  ;;  %v2778_v25 = vor.u32 %v3798_v19, %v2777_v16 }
  0x94   :  { %1847 = vmatpush.bf16.msrb.mxu0 %v3094_v32  ;;  %v3033_v22 = vld [vmem:[#allocation5 + $0x3a8] sm:$0xf]  ;;  %v3862_v23 = vld [vmem:[#allocation5 + $0x3b4] sm:$0xf0]  ;;  %v2906_v26 = vor.u32 %v3830_v21, %v2905_v20 }
  0x95   :  { %1861 = vmatpush.bf16.msrb.mxu1 %v3222_v35  ;;  %v2633_v27 = vld [vmem:[#allocation5 + $0x88] sm:$0xf]  ;;  %v3762_v28 = vld [vmem:[#allocation5 + $0x94] sm:$0xf0]  ;;  %v3034_v30 = vor.u32 %v3862_v23, %v3033_v22 }
  0x96   :  { %1875 = vmatpush.bf16.msrb.mxu2 %v3350_v36  ;;  %v2761_v29 = vld [vmem:[#allocation5 + $0x188] sm:$0xf]  ;;  %v3794_v31 = vld [vmem:[#allocation5 + $0x194] sm:$0xf0]  ;;  %v2634_v36 = vor.u32 %v3762_v28, %v2633_v27 }
  0x97   :  { %1889 = vmatpush.bf16.msrb.mxu3 %v3478_v41  ;;  %v2889_v32 = vld [vmem:[#allocation5 + $0x288] sm:$0xf]  ;;  %v3826_v33 = vld [vmem:[#allocation5 + $0x294] sm:$0xf0]  ;;  %v2762_v37 = vor.u32 %v3794_v31, %v2761_v29 }
  0x98   :  { %1848 = vmatpush.bf16.msrb.mxu0 %v3078_v51  ;;  %v3017_v34 = vld [vmem:[#allocation5 + $0x388] sm:$0xf]  ;;  %v3858_v35 = vld [vmem:[#allocation5 + $0x394] sm:$0xf0]  ;;  %v2890_v38 = vor.u32 %v3826_v33, %v2889_v32 }
  0x99   :  { %1862 = vmatpush.bf16.msrb.mxu1 %v3206_v55  ;;  %v2617_v40 = vld [vmem:[#allocation5 + $0x68] sm:$0xf]  ;;  %v3758_v41 = vld [vmem:[#allocation5 + $0x74] sm:$0xf0]  ;;  %v3018_v45 = vor.u32 %v3858_v35, %v3017_v34 }
  0x9a   :  { %1876 = vmatpush.bf16.msrb.mxu2 %v3334_v56  ;;  %v2745_v42 = vld [vmem:[#allocation5 + $0x168] sm:$0xf]  ;;  %v3790_v46 = vld [vmem:[#allocation5 + $0x174] sm:$0xf0]  ;;  %v2618_v52 = vor.u32 %v3758_v41, %v2617_v40 }
  0x9b   :  { %1890 = vmatpush.bf16.msrb.mxu3 %v3462_v60  ;;  %1849 = vmatmul.bf16.vlgmr.msrb.gmra.mxu0 %v4294_v39  ;;  %v2873_v48 = vld [vmem:[#allocation5 + $0x268] sm:$0xf]  ;;  %v3822_v49 = vld [vmem:[#allocation5 + $0x274] sm:$0xf0]  ;;  %v2746_v53 = vor.u32 %v3790_v46, %v2745_v42 }
  0x9c   :  { %1897 = vmatpush.bf16.msra.mxu0 %v2682_v61  ;;  %1863 = vmatmul.bf16.vlgmr.msrb.gmra.mxu1 %v4298_v44  ;;  %v3001_v50 = vld [vmem:[#allocation5 + $0x368] sm:$0xf]  ;;  %v3854_v51 = vld [vmem:[#allocation5 + $0x374] sm:$0xf0]  ;;  %v2874_v54 = vor.u32 %v3822_v49, %v2873_v48 }
  0x9d   :  { %1911 = vmatpush.bf16.msra.mxu1 %v2810_v62  ;;  %1877 = vmatmul.bf16.vlgmr.msrb.gmra.mxu2 %v4296_v43  ;;  %v2601_v55 = vld [vmem:[#allocation5 + $0x48] sm:$0xf]  ;;  %v3754_v56 = vld [vmem:[#allocation5 + $0x54] sm:$0xf0]  ;;  %v3002_v59 = vor.u32 %v3854_v51, %v3001_v50 }
  0x9e   :  { %1925 = vmatpush.bf16.msra.mxu2 %v2938_v63  ;;  %1891 = vmatmul.bf16.vlgmr.msrb.gmra.mxu3 %v4300_v47  ;;  %v2729_v57 = vld [vmem:[#allocation5 + $0x148] sm:$0xf]  ;;  %v3786_v60 = vld [vmem:[#allocation5 + $0x154] sm:$0xf0]  ;;  %v2602_v2 = vor.u32 %v3754_v56, %v2601_v55 }
  0x9f   :  { %1939 = vmatpush.bf16.msra.mxu3 %v3066_v4  ;;  %v2857_v61 = vld [vmem:[#allocation5 + $0x248] sm:$0xf]  ;;  %v3818_v62 = vld [vmem:[#allocation5 + $0x254] sm:$0xf0]  ;;  %v2730_v3 = vor.u32 %v3786_v60, %v2729_v57 }
  0xa0   :  { %1898 = vmatpush.bf16.msra.mxu0 %v2666_v11  ;;  %v2985_v63 = vld [vmem:[#allocation5 + $0x348] sm:$0xf]  ;;  %v3850_v0 = vld [vmem:[#allocation5 + $0x354] sm:$0xf0]  ;;  %v2858_v4 = vor.u32 %v3818_v62, %v2857_v61 }
  0xa1   :  { %1912 = vmatpush.bf16.msra.mxu1 %v2794_v12  ;;  %v2585_v5 = vld [vmem:[#allocation5 + $0x28] sm:$0xf]  ;;  %v3750_v6 = vld [vmem:[#allocation5 + $0x34] sm:$0xf0]  ;;  %v2986_v8 = vor.u32 %v3850_v0, %v2985_v63 }
  0xa2   :  { %1926 = vmatpush.bf16.msra.mxu2 %v2922_v13  ;;  %v2713_v7 = vld [vmem:[#allocation5 + $0x128] sm:$0xf]  ;;  %v3782_v9 = vld [vmem:[#allocation5 + $0x134] sm:$0xf0]  ;;  %v2586_v15 = vor.u32 %v3750_v6, %v2585_v5 }
  0xa3   :  { %1940 = vmatpush.bf16.msra.mxu3 %v3050_v18  ;;  %v2841_v11 = vld [vmem:[#allocation5 + $0x228] sm:$0xf]  ;;  %v3814_v12 = vld [vmem:[#allocation5 + $0x234] sm:$0xf0]  ;;  %v2714_v19 = vor.u32 %v3782_v9, %v2713_v7 }
  0xa4   :  { %1899 = vmatpush.bf16.msra.mxu0 %v2650_v24  ;;  %v2969_v13 = vld [vmem:[#allocation5 + $0x328] sm:$0xf]  ;;  %v3846_v14 = vld [vmem:[#allocation5 + $0x334] sm:$0xf0]  ;;  %v2842_v20 = vor.u32 %v3814_v12, %v2841_v11 }
  0xa5   :  { %1913 = vmatpush.bf16.msra.mxu1 %v2778_v25  ;;  %v2569_v16 = vld [vmem:[#allocation5 + $0x8] sm:$0xf]  ;;  %v3746_v18 = vld [vmem:[#allocation5 + $0x14] sm:$0xf0]  ;;  %v2970_v24 = vor.u32 %v3846_v14, %v2969_v13 }
  0xa6   :  { %1927 = vmatpush.bf16.msra.mxu2 %v2906_v26  ;;  %v2697_v21 = vld [vmem:[#allocation5 + $0x108] sm:$0xf]  ;;  %v3778_v22 = vld [vmem:[#allocation5 + $0x114] sm:$0xf0]  ;;  %v2570_v31 = vor.u32 %v3746_v18, %v2569_v16 }
  0xa7   :  { %1941 = vmatpush.bf16.msra.mxu3 %v3034_v30  ;;  %v2825_v23 = vld [vmem:[#allocation5 + $0x208] sm:$0xf]  ;;  %v3810_v25 = vld [vmem:[#allocation5 + $0x214] sm:$0xf0]  ;;  %v2698_v35 = vor.u32 %v3778_v22, %v2697_v21 }
  0xa8   :  { %1900 = vmatpush.bf16.msra.mxu0 %v2634_v36  ;;  %v2953_v26 = vld [vmem:[#allocation5 + $0x308] sm:$0xf]  ;;  %v3842_v27 = vld [vmem:[#allocation5 + $0x314] sm:$0xf0]  ;;  %v2826_v36 = vor.u32 %v3810_v25, %v2825_v23 }
  0xa9   :  { %1914 = vmatpush.bf16.msra.mxu1 %v2762_v37  ;;  %v3193_v28 = vld [vmem:[#allocation5 + $0x4e8] sm:$0xf]  ;;  %v3902_v29 = vld [vmem:[#allocation5 + $0x4f4] sm:$0xf0]  ;;  %v2954_v40 = vor.u32 %v3842_v27, %v2953_v26 }
  0xaa   :  { %1928 = vmatpush.bf16.msra.mxu2 %v2890_v38  ;;  %v3321_v30 = vld [vmem:[#allocation5 + $0x5e8] sm:$0xf]  ;;  %v3934_v32 = vld [vmem:[#allocation5 + $0x5f4] sm:$0xf0]  ;;  %v3194_v41 = vor.u32 %v3902_v29, %v3193_v28 }
  0xab   :  { %1942 = vmatpush.bf16.msra.mxu3 %v3018_v45  ;;  %v3449_v33 = vld [vmem:[#allocation5 + $0x6e8] sm:$0xf]  ;;  %v3966_v34 = vld [vmem:[#allocation5 + $0x6f4] sm:$0xf0]  ;;  %v3322_v42 = vor.u32 %v3934_v32, %v3321_v30 }
  0xac   :  { %1901 = vmatpush.bf16.msra.mxu0 %v2618_v52  ;;  %v3577_v37 = vld [vmem:[#allocation5 + $0x7e8] sm:$0xf]  ;;  %v3998_v38 = vld [vmem:[#allocation5 + $0x7f4] sm:$0xf0]  ;;  %v3450_v45 = vor.u32 %v3966_v34, %v3449_v33 }
  0xad   :  { %1915 = vmatpush.bf16.msra.mxu1 %v2746_v53  ;;  %v3177_v46 = vld [vmem:[#allocation5 + $0x4c8] sm:$0xf]  ;;  %v3898_v48 = vld [vmem:[#allocation5 + $0x4d4] sm:$0xf0]  ;;  %v3578_v50 = vor.u32 %v3998_v38, %v3577_v37 }
  0xae   :  { %1929 = vmatpush.bf16.msra.mxu2 %v2874_v54  ;;  %v3305_v49 = vld [vmem:[#allocation5 + $0x5c8] sm:$0xf]  ;;  %v3930_v51 = vld [vmem:[#allocation5 + $0x5d4] sm:$0xf0]  ;;  %v3178_v56 = vor.u32 %v3898_v48, %v3177_v46 }
  0xaf   :  { %1943 = vmatpush.bf16.msra.mxu3 %v3002_v59  ;;  %v3433_v52 = vld [vmem:[#allocation5 + $0x6c8] sm:$0xf]  ;;  %v3962_v53 = vld [vmem:[#allocation5 + $0x6d4] sm:$0xf0]  ;;  %v3306_v57 = vor.u32 %v3930_v51, %v3305_v49 }
  0xb0   :  { %1902 = vmatpush.bf16.msra.mxu0 %v2602_v2  ;;  %v3561_v54 = vld [vmem:[#allocation5 + $0x7c8] sm:$0xf]  ;;  %v3994_v55 = vld [vmem:[#allocation5 + $0x7d4] sm:$0xf0]  ;;  %v3434_v59 = vor.u32 %v3962_v53, %v3433_v52 }
  0xb1   :  { %1916 = vmatpush.bf16.msra.mxu1 %v2730_v3  ;;  %v3161_v60 = vld [vmem:[#allocation5 + $0x4a8] sm:$0xf]  ;;  %v3894_v61 = vld [vmem:[#allocation5 + $0x4b4] sm:$0xf0]  ;;  %v3562_v63 = vor.u32 %v3994_v55, %v3561_v54 }
  0xb2   :  { %1930 = vmatpush.bf16.msra.mxu2 %v2858_v4  ;;  %v3289_v62 = vld [vmem:[#allocation5 + $0x5a8] sm:$0xf]  ;;  %v3926_v0 = vld [vmem:[#allocation5 + $0x5b4] sm:$0xf0]  ;;  %v3162_v6 = vor.u32 %v3894_v61, %v3161_v60 }
  0xb3   :  { %1944 = vmatpush.bf16.msra.mxu3 %v2986_v8  ;;  %v3417_v2 = vld [vmem:[#allocation5 + $0x6a8] sm:$0xf]  ;;  %v3958_v3 = vld [vmem:[#allocation5 + $0x6b4] sm:$0xf0]  ;;  %v3290_v7 = vor.u32 %v3926_v0, %v3289_v62 }
  0xb4   :  { %1903 = vmatpush.bf16.msra.mxu0 %v2586_v15  ;;  %v3545_v4 = vld [vmem:[#allocation5 + $0x7a8] sm:$0xf]  ;;  %v3990_v5 = vld [vmem:[#allocation5 + $0x7b4] sm:$0xf0]  ;;  %v3418_v8 = vor.u32 %v3958_v3, %v3417_v2 }
  0xb5   :  { %1917 = vmatpush.bf16.msra.mxu1 %v2714_v19  ;;  %v3145_v9 = vld [vmem:[#allocation5 + $0x488] sm:$0xf]  ;;  %v3890_v11 = vld [vmem:[#allocation5 + $0x494] sm:$0xf0]  ;;  %v3546_v13 = vor.u32 %v3990_v5, %v3545_v4 }
  0xb6   :  { %1931 = vmatpush.bf16.msra.mxu2 %v2842_v20  ;;  %v3273_v12 = vld [vmem:[#allocation5 + $0x588] sm:$0xf]  ;;  %v3922_v14 = vld [vmem:[#allocation5 + $0x594] sm:$0xf0]  ;;  %v3146_v20 = vor.u32 %v3890_v11, %v3145_v9  ;;  %v3772_v11 = vld [vmem:[#allocation5 + $0xec] sm:$0xf] }
  0xb7   :  { %1945 = vmatpush.bf16.msra.mxu3 %v2970_v24  ;;  %v3401_v15 = vld [vmem:[#allocation5 + $0x688] sm:$0xf]  ;;  %v3954_v16 = vld [vmem:[#allocation5 + $0x694] sm:$0xf0]  ;;  %v3274_v21 = vor.u32 %v3922_v14, %v3273_v12  ;;  %v2683_v12 = vld [vmem:[#allocation5 + $0xf8] sm:$0xf0] }
  0xb8   :  { %1904 = vmatpush.bf16.msra.mxu0 %v2570_v31  ;;  %v3529_v18 = vld [vmem:[#allocation5 + $0x788] sm:$0xf]  ;;  %v3986_v19 = vld [vmem:[#allocation5 + $0x794] sm:$0xf0]  ;;  %v3402_v22 = vor.u32 %v3954_v16, %v3401_v15  ;;  %v2811_v15 = vld [vmem:[#allocation5 + $0x1f8] sm:$0xf0] }
  0xb9   :  { %1918 = vmatpush.bf16.msra.mxu1 %v2698_v35  ;;  %v3129_v23 = vld [vmem:[#allocation5 + $0x468] sm:$0xf]  ;;  %v3886_v24 = vld [vmem:[#allocation5 + $0x474] sm:$0xf0]  ;;  %v3530_v26 = vor.u32 %v3986_v19, %v3529_v18  ;;  %v3836_v16 = vld [vmem:[#allocation5 + $0x2ec] sm:$0xf] }
  0xba   :  { %1932 = vmatpush.bf16.msra.mxu2 %v2826_v36  ;;  %v3257_v25 = vld [vmem:[#allocation5 + $0x568] sm:$0xf]  ;;  %v3918_v27 = vld [vmem:[#allocation5 + $0x574] sm:$0xf0]  ;;  %v3130_v32 = vor.u32 %v3886_v24, %v3129_v23  ;;  %v2939_v18 = vld [vmem:[#allocation5 + $0x2f8] sm:$0xf0]  ;;  %v2686_v24 = vor.u32 %v3772_v11, %v2683_v12 }
  0xbb   :  { %1946 = vmatpush.bf16.msra.mxu3 %v2954_v40  ;;  %1905 = vmatmul.bf16.vlgmr.msra.gmra.mxu0 %v4282_v58  ;;  %v3385_v28 = vld [vmem:[#allocation5 + $0x668] sm:$0xf]  ;;  %v3950_v29 = vld [vmem:[#allocation5 + $0x674] sm:$0xf0]  ;;  %v3258_v33 = vor.u32 %v3918_v27, %v3257_v25  ;;  %v3768_v27 = vld [vmem:[#allocation5 + $0xcc] sm:$0xf] }
  0xbc   :  { %1953 = vmatpush.bf16.msrb.mxu0 %v3194_v41  ;;  %1919 = vmatmul.bf16.vlgmr.msra.gmra.mxu1 %v4288_v10  ;;  %v3513_v30 = vld [vmem:[#allocation5 + $0x768] sm:$0xf]  ;;  %v3982_v31 = vld [vmem:[#allocation5 + $0x774] sm:$0xf0]  ;;  %v3386_v34 = vor.u32 %v3950_v29, %v3385_v28  ;;  %v2667_v28 = vld [vmem:[#allocation5 + $0xd8] sm:$0xf0] }
  0xbd   :  { %1967 = vmatpush.bf16.msrb.mxu1 %v3322_v42  ;;  %1933 = vmatmul.bf16.vlgmr.msra.gmra.mxu2 %v4284_v1  ;;  %v3113_v35 = vld [vmem:[#allocation5 + $0x448] sm:$0xf]  ;;  %v3882_v36 = vld [vmem:[#allocation5 + $0x454] sm:$0xf0]  ;;  %v3514_v38 = vor.u32 %v3982_v31, %v3513_v30  ;;  %v3800_v29 = vld [vmem:[#allocation5 + $0x1cc] sm:$0xf] }
  0xbe   :  { %1981 = vmatpush.bf16.msrb.mxu2 %v3450_v45  ;;  %1947 = vmatmul.bf16.vlgmr.msra.gmra.mxu3 %v4290_v17  ;;  %v3241_v37 = vld [vmem:[#allocation5 + $0x548] sm:$0xf]  ;;  %v3914_v40 = vld [vmem:[#allocation5 + $0x554] sm:$0xf0]  ;;  %v3114_v48 = vor.u32 %v3882_v36, %v3113_v35  ;;  %v2795_v31 = vld [vmem:[#allocation5 + $0x1d8] sm:$0xf0]  ;;  %v2670_v36 = vor.u32 %v3768_v27, %v2667_v28 }
  0xbf   :  { %1995 = vmatpush.bf16.msrb.mxu3 %v3578_v50  ;;  %v3369_v41 = vld [vmem:[#allocation5 + $0x648] sm:$0xf]  ;;  %v3946_v42 = vld [vmem:[#allocation5 + $0x654] sm:$0xf0]  ;;  %v3242_v49 = vor.u32 %v3914_v40, %v3241_v37  ;;  %v3051_v35 = vld [vmem:[#allocation5 + $0x3d8] sm:$0xf0]  ;;  %v2798_v37 = vor.u32 %v3800_v29, %v2795_v31 }
  0xc0   :  { %1954 = vmatpush.bf16.msrb.mxu0 %v3178_v56  ;;  %v3497_v45 = vld [vmem:[#allocation5 + $0x748] sm:$0xf]  ;;  %v3978_v46 = vld [vmem:[#allocation5 + $0x754] sm:$0xf0]  ;;  %v3370_v50 = vor.u32 %v3946_v42, %v3369_v41  ;;  %v3764_v40 = vld [vmem:[#allocation5 + $0xac] sm:$0xf] }
  0xc1   :  { %1968 = vmatpush.bf16.msrb.mxu1 %v3306_v57  ;;  %v3097_v51 = vld [vmem:[#allocation5 + $0x428] sm:$0xf]  ;;  %v3878_v52 = vld [vmem:[#allocation5 + $0x434] sm:$0xf0]  ;;  %v3498_v54 = vor.u32 %v3978_v46, %v3497_v45  ;;  %v2651_v41 = vld [vmem:[#allocation5 + $0xb8] sm:$0xf0] }
  0xc2   :  { %1982 = vmatpush.bf16.msrb.mxu2 %v3434_v59  ;;  %v3225_v53 = vld [vmem:[#allocation5 + $0x528] sm:$0xf]  ;;  %v3910_v55 = vld [vmem:[#allocation5 + $0x534] sm:$0xf0]  ;;  %v3098_v61 = vor.u32 %v3878_v52, %v3097_v51  ;;  %v3796_v42 = vld [vmem:[#allocation5 + $0x1ac] sm:$0xf]  ;;  %v2654_v52 = vor.u32 %v3764_v40, %v2651_v41 }
  0xc3   :  { %1996 = vmatpush.bf16.msrb.mxu3 %v3562_v63  ;;  %v3353_v56 = vld [vmem:[#allocation5 + $0x628] sm:$0xf]  ;;  %v3942_v57 = vld [vmem:[#allocation5 + $0x634] sm:$0xf0]  ;;  %v3226_v0 = vor.u32 %v3910_v55, %v3225_v53  ;;  %v2779_v46 = vld [vmem:[#allocation5 + $0x1b8] sm:$0xf0] }
  0xc4   :  { %1955 = vmatpush.bf16.msrb.mxu0 %v3162_v6  ;;  %v3481_v59 = vld [vmem:[#allocation5 + $0x728] sm:$0xf]  ;;  %v3974_v60 = vld [vmem:[#allocation5 + $0x734] sm:$0xf0]  ;;  %v3354_v2 = vor.u32 %v3942_v57, %v3353_v56  ;;  %v3035_v51 = vld [vmem:[#allocation5 + $0x3b8] sm:$0xf0]  ;;  %v2782_v53 = vor.u32 %v3796_v42, %v2779_v46 }
  0xc5   :  { %1969 = vmatpush.bf16.msrb.mxu1 %v3290_v7  ;;  %v3081_v62 = vld [vmem:[#allocation5 + $0x408] sm:$0xf]  ;;  %v3874_v63 = vld [vmem:[#allocation5 + $0x414] sm:$0xf0]  ;;  %v3482_v6 = vor.u32 %v3974_v60, %v3481_v59  ;;  %v3760_v55 = vld [vmem:[#allocation5 + $0x8c] sm:$0xf] }
  0xc6   :  { %1983 = vmatpush.bf16.msrb.mxu2 %v3418_v8  ;;  %v3209_v3 = vld [vmem:[#allocation5 + $0x508] sm:$0xf]  ;;  %v3906_v4 = vld [vmem:[#allocation5 + $0x514] sm:$0xf0]  ;;  %v3082_v14 = vor.u32 %v3874_v63, %v3081_v62  ;;  %v2635_v56 = vld [vmem:[#allocation5 + $0x98] sm:$0xf0] }
  0xc7   :  { %1997 = vmatpush.bf16.msrb.mxu3 %v3546_v13  ;;  %v3337_v5 = vld [vmem:[#allocation5 + $0x608] sm:$0xf]  ;;  %v3938_v7 = vld [vmem:[#allocation5 + $0x614] sm:$0xf0]  ;;  %v3804_v13 = vld [vmem:[#allocation5 + $0x1ec] sm:$0xf]  ;;  %v3210_v19 = vor.u32 %v3906_v4, %v3209_v3  ;;  %v4322_v3 = vpop.f32.mrf.mxu0 }
  0xc8   :  { %1956 = vmatpush.bf16.msrb.mxu0 %v3146_v20  ;;  %v3465_v8 = vld [vmem:[#allocation5 + $0x708] sm:$0xf]  ;;  %v3970_v9 = vld [vmem:[#allocation5 + $0x714] sm:$0xf0]  ;;  %v3338_v20 = vor.u32 %v3938_v7, %v3337_v5  ;;  %v2814_v25 = vor.u32 %v3804_v13, %v2811_v15  ;;  %v3792_v57 = vld [vmem:[#allocation5 + $0x18c] sm:$0xf] }
  0xc9   :  { %1970 = vmatpush.bf16.msrb.mxu1 %v3274_v21  ;;  %v3868_v21 = vld [vmem:[#allocation5 + $0x3ec] sm:$0xf]  ;;  %v3466_v23 = vor.u32 %v3970_v9, %v3465_v8  ;;  %v2763_v60 = vld [vmem:[#allocation5 + $0x198] sm:$0xf0]  ;;  %v4324_v9 = vpop.f32.mrf.mxu1 }
  0xca   :  { %1984 = vmatpush.bf16.msrb.mxu2 %v3402_v22  ;;  %v3067_v22 = vld [vmem:[#allocation5 + $0x3f8] sm:$0xf0]  ;;  %v3856_v63 = vld [vmem:[#allocation5 + $0x38c] sm:$0xf]  ;;  %v2766_v4 = vor.u32 %v3792_v57, %v2763_v60 }
  0xcb   :  { %1998 = vmatpush.bf16.msrb.mxu3 %v3530_v26  ;;  %v2942_v26 = vor.u32 %v3836_v16, %v2939_v18  ;;  %v3070_v30 = vor.u32 %v3868_v21, %v3067_v22  ;;  %v2891_v62 = vld [vmem:[#allocation5 + $0x298] sm:$0xf0]  ;;  %v3788_v8 = vld [vmem:[#allocation5 + $0x16c] sm:$0xf] }
  0xcc   :  { %1957 = vmatpush.bf16.msrb.mxu0 %v3130_v32  ;;  %v3832_v32 = vld [vmem:[#allocation5 + $0x2cc] sm:$0xf]  ;;  %v2619_v7 = vld [vmem:[#allocation5 + $0x78] sm:$0xf0] }
  0xcd   :  { %1971 = vmatpush.bf16.msrb.mxu1 %v3258_v33  ;;  %v2923_v33 = vld [vmem:[#allocation5 + $0x2d8] sm:$0xf0]  ;;  %v3820_v13 = vld [vmem:[#allocation5 + $0x26c] sm:$0xf] }
  0xce   :  { %1985 = vmatpush.bf16.msrb.mxu2 %v3386_v34  ;;  %v3864_v34 = vld [vmem:[#allocation5 + $0x3cc] sm:$0xf]  ;;  %v2747_v12 = vld [vmem:[#allocation5 + $0x178] sm:$0xf0] }
  0xcf   :  { %1999 = vmatpush.bf16.msrb.mxu3 %v3514_v38  ;;  %v2926_v38 = vor.u32 %v3832_v32, %v2923_v33  ;;  %v3054_v45 = vor.u32 %v3864_v34, %v3051_v35  ;;  %v3852_v15 = vld [vmem:[#allocation5 + $0x36c] sm:$0xf]  ;;  %v3003_v16 = vld [vmem:[#allocation5 + $0x378] sm:$0xf0]  ;;  %v4328_v32 = vpop.f32.mrf.mxu3 }
  0xd0   :  { %1958 = vmatpush.bf16.msrb.mxu0 %v3114_v48  ;;  %v3828_v48 = vld [vmem:[#allocation5 + $0x2ac] sm:$0xf]  ;;  %v2603_v22 = vld [vmem:[#allocation5 + $0x58] sm:$0xf0] }
  0xd1   :  { %1972 = vmatpush.bf16.msrb.mxu1 %v3242_v49  ;;  %v2907_v49 = vld [vmem:[#allocation5 + $0x2b8] sm:$0xf0]  ;;  %v3752_v21 = vld [vmem:[#allocation5 + $0x4c] sm:$0xf] }
  0xd2   :  { %1986 = vmatpush.bf16.msrb.mxu2 %v3370_v50  ;;  %v3860_v50 = vld [vmem:[#allocation5 + $0x3ac] sm:$0xf]  ;;  %v2859_v27 = vld [vmem:[#allocation5 + $0x258] sm:$0xf0]  ;;  %v2606_v31 = vor.u32 %v3752_v21, %v2603_v22 }
  0xd3   :  { %2000 = vmatpush.bf16.msrb.mxu3 %v3498_v54  ;;  %v2910_v54 = vor.u32 %v3828_v48, %v2907_v49  ;;  %v3038_v59 = vor.u32 %v3860_v50, %v3035_v51  ;;  %v3848_v28 = vld [vmem:[#allocation5 + $0x34c] sm:$0xf]  ;;  %v2987_v29 = vld [vmem:[#allocation5 + $0x358] sm:$0xf0]  ;;  %v4332_v49 = vpop.f32.mrf.mxu1 }
  0xd4   :  { %1959 = vmatpush.bf16.msrb.mxu0 %v3098_v61  ;;  %v3824_v61 = vld [vmem:[#allocation5 + $0x28c] sm:$0xf]  ;;  %v2715_v40 = vld [vmem:[#allocation5 + $0x138] sm:$0xf0] }
  0xd5   :  { %1973 = vmatpush.bf16.msrb.mxu1 %v3226_v0  ;;  %v3019_v0 = vld [vmem:[#allocation5 + $0x398] sm:$0xf0]  ;;  %v2894_v5 = vor.u32 %v3824_v61, %v2891_v62  ;;  %v3748_v35 = vld [vmem:[#allocation5 + $0x2c] sm:$0xf] }
  0xd6   :  { %1987 = vmatpush.bf16.msrb.mxu2 %v3354_v2  ;;  %v2638_v2 = vor.u32 %v3760_v55, %v2635_v56  ;;  %v3022_v11 = vor.u32 %v3856_v63, %v3019_v0  ;;  %v3812_v41 = vld [vmem:[#allocation5 + $0x22c] sm:$0xf]  ;;  %v2843_v42 = vld [vmem:[#allocation5 + $0x238] sm:$0xf0] }
  0xd7   :  { %2001 = vmatpush.bf16.msrb.mxu3 %v3482_v6  ;;  %v3756_v6 = vld [vmem:[#allocation5 + $0x6c] sm:$0xf]  ;;  %v2971_v48 = vld [vmem:[#allocation5 + $0x338] sm:$0xf0] }
  0xd8   :  { %1960 = vmatpush.bf16.msrb.mxu0 %v3082_v14  ;;  %v2875_v14 = vld [vmem:[#allocation5 + $0x278] sm:$0xf0]  ;;  %v2622_v18 = vor.u32 %v3756_v6, %v2619_v7  ;;  %v3844_v46 = vld [vmem:[#allocation5 + $0x32c] sm:$0xf] }
  0xd9   :  { %1974 = vmatpush.bf16.msrb.mxu1 %v3210_v19  ;;  %v2750_v19 = vor.u32 %v3788_v8, %v2747_v12  ;;  %v3744_v51 = vld [vmem:[#allocation5 + $0xc] sm:$0xf]  ;;  %v2699_v56 = vld [vmem:[#allocation5 + $0x118] sm:$0xf0] }
  0xda   :  { %1988 = vmatpush.bf16.msrb.mxu2 %v3338_v20  ;;  %v2878_v20 = vor.u32 %v3820_v13, %v2875_v14  ;;  %v3776_v55 = vld [vmem:[#allocation5 + $0x10c] sm:$0xf]  ;;  %v2827_v60 = vld [vmem:[#allocation5 + $0x218] sm:$0xf0] }
  0xdb   :  { %2002 = vmatpush.bf16.msrb.mxu3 %v3466_v23  ;;  %1961 = vmatmul.bf16.vlgmr.msrb.gmra.mxu0 %v4294_v39  ;;  %v3784_v23 = vld [vmem:[#allocation5 + $0x14c] sm:$0xf]  ;;  %v2955_v62 = vld [vmem:[#allocation5 + $0x318] sm:$0xf0]  ;;  %v2702_v8 = vor.u32 %v3776_v55, %v2699_v56 }
  0xdc   :  { %2009 = vmatpush.bf16.msra.mxu0 %v2686_v24  ;;  %1975 = vmatmul.bf16.vlgmr.msrb.gmra.mxu1 %v4298_v44  ;;  %v3006_v24 = vor.u32 %v3852_v15, %v3003_v16  ;;  %v3808_v57 = vld [vmem:[#allocation5 + $0x20c] sm:$0xf]  ;;  %v3195_v0 = vld [vmem:[#allocation5 + $0x4f8] sm:$0xf0] }
  0xdd   :  { %2023 = vmatpush.bf16.msra.mxu1 %v2814_v25  ;;  %1989 = vmatmul.bf16.vlgmr.msrb.gmra.mxu2 %v4296_v43  ;;  %v2731_v25 = vld [vmem:[#allocation5 + $0x158] sm:$0xf0]  ;;  %v3840_v61 = vld [vmem:[#allocation5 + $0x30c] sm:$0xf] }
  0xde   :  { %2037 = vmatpush.bf16.msra.mxu2 %v2942_v26  ;;  %2003 = vmatmul.bf16.vlgmr.msrb.gmra.mxu3 %v4300_v47  ;;  %v3816_v26 = vld [vmem:[#allocation5 + $0x24c] sm:$0xf]  ;;  %v2734_v33 = vor.u32 %v3784_v23, %v2731_v25  ;;  %v3451_v7 = vld [vmem:[#allocation5 + $0x6f8] sm:$0xf0]  ;;  %v2958_v15 = vor.u32 %v3840_v61, %v2955_v62 }
  0xdf   :  { %2051 = vmatpush.bf16.msra.mxu3 %v3070_v30  ;;  %v4326_v30 = vpop.f32.mrf.mxu2  ;;  %v2862_v34 = vor.u32 %v3816_v26, %v2859_v27  ;;  %v3900_v63 = vld [vmem:[#allocation5 + $0x4ec] sm:$0xf]  ;;  %v3579_v13 = vld [vmem:[#allocation5 + $0x7f8] sm:$0xf0] }
  0xe0   :  { %2010 = vmatpush.bf16.msra.mxu0 %v2670_v36  ;;  %v2587_v36 = vld [vmem:[#allocation5 + $0x38] sm:$0xf0]  ;;  %v3964_v6 = vld [vmem:[#allocation5 + $0x6ec] sm:$0xf]  ;;  %v3198_v16 = vor.u32 %v3900_v63, %v3195_v0 }
  0xe1   :  { %2024 = vmatpush.bf16.msra.mxu1 %v2798_v37  ;;  %v3780_v37 = vld [vmem:[#allocation5 + $0x12c] sm:$0xf]  ;;  %v2590_v50 = vor.u32 %v3748_v35, %v2587_v36  ;;  %v3179_v22 = vld [vmem:[#allocation5 + $0x4d8] sm:$0xf0] }
  0xe2   :  { %2038 = vmatpush.bf16.msra.mxu2 %v2926_v38  ;;  %v2990_v38 = vor.u32 %v3848_v28, %v2987_v29  ;;  %v3996_v12 = vld [vmem:[#allocation5 + $0x7ec] sm:$0xf]  ;;  %v3307_v25 = vld [vmem:[#allocation5 + $0x5d8] sm:$0xf0] }
  0xe3   :  { %2052 = vmatpush.bf16.msra.mxu3 %v3054_v45  ;;  %v4330_v45 = vpop.f32.mrf.mxu0  ;;  %v3896_v21 = vld [vmem:[#allocation5 + $0x4cc] sm:$0xf]  ;;  %v3435_v27 = vld [vmem:[#allocation5 + $0x6d8] sm:$0xf0] }
  0xe4   :  { %2011 = vmatpush.bf16.msra.mxu0 %v2654_v52  ;;  %v2571_v52 = vld [vmem:[#allocation5 + $0x18] sm:$0xf0]  ;;  %v3928_v23 = vld [vmem:[#allocation5 + $0x5cc] sm:$0xf] }
  0xe5   :  { %2025 = vmatpush.bf16.msra.mxu1 %v2782_v53  ;;  %v2718_v53 = vor.u32 %v3780_v37, %v2715_v40  ;;  %v3960_v26 = vld [vmem:[#allocation5 + $0x6cc] sm:$0xf]  ;;  %v3310_v35 = vor.u32 %v3928_v23, %v3307_v25  ;;  %v3147_v56 = vld [vmem:[#allocation5 + $0x498] sm:$0xf0] }
  0xe6   :  { %2039 = vmatpush.bf16.msra.mxu2 %v2910_v54  ;;  %v2846_v54 = vor.u32 %v3812_v41, %v2843_v42  ;;  %v3992_v29 = vld [vmem:[#allocation5 + $0x7cc] sm:$0xf]  ;;  %v3438_v36 = vor.u32 %v3960_v26, %v3435_v27  ;;  %v3291_v42 = vld [vmem:[#allocation5 + $0x5b8] sm:$0xf0] }
  0xe7   :  { %2053 = vmatpush.bf16.msra.mxu3 %v3038_v59  ;;  %v2974_v59 = vor.u32 %v3844_v46, %v2971_v48  ;;  %v4334_v14 = vpop.f32.mrf.mxu2  ;;  %v3892_v37 = vld [vmem:[#allocation5 + $0x4ac] sm:$0xf]  ;;  %v3419_v48 = vld [vmem:[#allocation5 + $0x6b8] sm:$0xf0] }
  0xe8   :  { %2012 = vmatpush.bf16.msra.mxu0 %v2638_v2  ;;  %v3932_v2 = vld [vmem:[#allocation5 + $0x5ec] sm:$0xf]  ;;  %v3531_v63 = vld [vmem:[#allocation5 + $0x798] sm:$0xf0] }
  0xe9   :  { %2026 = vmatpush.bf16.msra.mxu1 %v2766_v4  ;;  %v2574_v4 = vor.u32 %v3744_v51, %v2571_v52  ;;  %v3924_v40 = vld [vmem:[#allocation5 + $0x5ac] sm:$0xf]  ;;  %v3547_v51 = vld [vmem:[#allocation5 + $0x7b8] sm:$0xf0] }
  0xea   :  { %2040 = vmatpush.bf16.msra.mxu2 %v2894_v5  ;;  %v3323_v5 = vld [vmem:[#allocation5 + $0x5f8] sm:$0xf0]  ;;  %v3956_v46 = vld [vmem:[#allocation5 + $0x6ac] sm:$0xf] }
  0xeb   :  { %2054 = vmatpush.bf16.msra.mxu3 %v3022_v11  ;;  %v2830_v11 = vor.u32 %v3808_v57, %v2827_v60  ;;  %v4338_v28 = vpop.f32.mrf.mxu0  ;;  %v3888_v55 = vld [vmem:[#allocation5 + $0x48c] sm:$0xf]  ;;  %v3275_v60 = vld [vmem:[#allocation5 + $0x598] sm:$0xf0] }
  0xec   :  { %2013 = vmatpush.bf16.msra.mxu0 %v2622_v18  ;;  %v4336_v18 = vpop.f32.mrf.mxu3  ;;  %v3952_v61 = vld [vmem:[#allocation5 + $0x68c] sm:$0xf]  ;;  %v3243_v27 = vld [vmem:[#allocation5 + $0x558] sm:$0xf0] }
  0xed   :  { %2027 = vmatpush.bf16.msra.mxu1 %v2750_v19  ;;  %v3326_v19 = vor.u32 %v3932_v2, %v3323_v5  ;;  %v3884_v5 = vld [vmem:[#allocation5 + $0x46c] sm:$0xf] }
  0xee   :  { %2041 = vmatpush.bf16.msra.mxu2 %v2878_v20  ;;  %v3454_v20 = vor.u32 %v3964_v6, %v3451_v7  ;;  %v3131_v6 = vld [vmem:[#allocation5 + $0x478] sm:$0xf0]  ;;  %v3916_v7 = vld [vmem:[#allocation5 + $0x56c] sm:$0xf] }
  0xef   :  { %2055 = vmatpush.bf16.msra.mxu3 %v3006_v24  ;;  %v3582_v24 = vor.u32 %v3996_v12, %v3579_v13  ;;  %v4346_v57 = vpop.f32.mrf.mxu2  ;;  %v3259_v12 = vld [vmem:[#allocation5 + $0x578] sm:$0xf0]  ;;  %v3948_v13 = vld [vmem:[#allocation5 + $0x66c] sm:$0xf] }
  0xf0   :  { %2014 = vmatpush.bf16.msra.mxu0 %v2606_v31  ;;  %v3563_v31 = vld [vmem:[#allocation5 + $0x7d8] sm:$0xf0]  ;;  %v3880_v23 = vld [vmem:[#allocation5 + $0x44c] sm:$0xf] }
  0xf1   :  { %2028 = vmatpush.bf16.msra.mxu1 %v2734_v33  ;;  %v4340_v33 = vpop.f32.mrf.mxu1  ;;  %v3566_v41 = vor.u32 %v3992_v29, %v3563_v31  ;;  %v3912_v25 = vld [vmem:[#allocation5 + $0x54c] sm:$0xf]  ;;  %v3371_v31 = vld [vmem:[#allocation5 + $0x658] sm:$0xf0] }
  0xf2   :  { %2042 = vmatpush.bf16.msra.mxu2 %v2862_v34  ;;  %v3182_v34 = vor.u32 %v3896_v21, %v3179_v22  ;;  %v3262_v21 = vor.u32 %v3916_v7, %v3259_v12  ;;  %v3944_v29 = vld [vmem:[#allocation5 + $0x64c] sm:$0xf] }
  0xf3   :  { %2056 = vmatpush.bf16.msra.mxu3 %v2990_v38  ;;  %v3163_v38 = vld [vmem:[#allocation5 + $0x4b8] sm:$0xf0]  ;;  %v4350_v0 = vpop.f32.mrf.mxu0  ;;  %v3936_v7 = vld [vmem:[#allocation5 + $0x60c] sm:$0xf] }
  0xf4   :  { %2015 = vmatpush.bf16.msra.mxu0 %v2590_v50  ;;  %v3988_v50 = vld [vmem:[#allocation5 + $0x7ac] sm:$0xf]  ;;  %v3166_v52 = vor.u32 %v3892_v37, %v3163_v38  ;;  %v4348_v62 = vpop.f32.mrf.mxu3 }
  0xf5   :  { %2029 = vmatpush.bf16.msra.mxu1 %v2718_v53  ;;  %v3294_v53 = vor.u32 %v3924_v40, %v3291_v42  ;;  %v3374_v42 = vor.u32 %v3944_v29, %v3371_v31  ;;  %v3968_v12 = vld [vmem:[#allocation5 + $0x70c] sm:$0xf]  ;;  %v4014_v29 = vld [vmem:[#allocation8 + $0x78] sm:$0xff] }
  0xf6   :  { %2043 = vmatpush.bf16.msra.mxu2 %v2846_v54  ;;  %v3422_v54 = vor.u32 %v3956_v46, %v3419_v48  ;;  %v3876_v48 = vld [vmem:[#allocation5 + $0x42c] sm:$0xf] }
  0xf7   :  { %2057 = vmatpush.bf16.msra.mxu3 %v2974_v59  ;;  %v3550_v59 = vor.u32 %v3988_v50, %v3547_v51  ;;  %v4356_v37 = vpop.f32.mrf.mxu2  ;;  %v3099_v50 = vld [vmem:[#allocation5 + $0x438] sm:$0xf0]  ;;  %v3908_v51 = vld [vmem:[#allocation5 + $0x52c] sm:$0xf] }
  0xf8   :  { %2016 = vmatpush.bf16.msra.mxu0 %v2574_v4 }
  0xf9   :  { %2030 = vmatpush.bf16.msra.mxu1 %v2702_v8  ;;  %v4352_v8 = vpop.f32.mrf.mxu1 }
  0xfa   :  { %2044 = vmatpush.bf16.msra.mxu2 %v2830_v11 }
  0xfb   :  { %2058 = vmatpush.bf16.msra.mxu3 %v2958_v15  ;;  %2017 = vmatmul.bf16.vlgmr.msra.gmra.mxu0 %v4282_v58  ;;  %v3403_v58 = vld [vmem:[#allocation5 + $0x698] sm:$0xf0]  ;;  %v1794_v46 = vpop.f32.mrf.mxu0 }
  0xfc   :  { %2065 = vmatpush.bf16.msrb.mxu0 %v3198_v16  ;;  %2031 = vmatmul.bf16.vlgmr.msra.gmra.mxu1 %v4288_v10  ;;  %v3150_v10 = vor.u32 %v3888_v55, %v3147_v56  ;;  %v3406_v4 = vor.u32 %v3952_v61, %v3403_v58  ;;  %v3387_v15 = vld [vmem:[#allocation5 + $0x678] sm:$0xf0]  ;;  %v3980_v16 = vld [vmem:[#allocation5 + $0x76c] sm:$0xf]  ;;  %v4358_v40 = vpop.f32.mrf.mxu3  ;;  %v3102_v58 = vor.u32 %v3876_v48, %v3099_v50 }
  0xfd   :  { %2079 = vmatpush.bf16.msrb.mxu1 %v3326_v19  ;;  %2045 = vmatmul.bf16.vlgmr.msra.gmra.mxu2 %v4284_v1  ;;  %v3920_v1 = vld [vmem:[#allocation5 + $0x58c] sm:$0xf]  ;;  %v3515_v19 = vld [vmem:[#allocation5 + $0x778] sm:$0xf0]  ;;  %v3390_v22 = vor.u32 %v3948_v13, %v3387_v15 }
  0xfe   :  { %2093 = vmatpush.bf16.msrb.mxu2 %v3454_v20  ;;  %2059 = vmatmul.bf16.vlgmr.msra.gmra.mxu3 %v4290_v17  ;;  %v3984_v17 = vld [vmem:[#allocation5 + $0x78c] sm:$0xf]  ;;  %v3278_v2 = vor.u32 %v3920_v1, %v3275_v60  ;;  %v3134_v20 = vor.u32 %v3884_v5, %v3131_v6  ;;  %v3518_v26 = vor.u32 %v3980_v16, %v3515_v19  ;;  %v3355_v55 = vld [vmem:[#allocation5 + $0x638] sm:$0xf0] }
  0xff   :  { %2107 = vmatpush.bf16.msrb.mxu3 %v3582_v24  ;;  %v3534_v11 = vor.u32 %v3984_v17, %v3531_v63  ;;  %v3115_v24 = vld [vmem:[#allocation5 + $0x458] sm:$0xf0]  ;;  %v3972_v1 = vld [vmem:[#allocation5 + $0x72c] sm:$0xf] }
 0x100   :  { %2066 = vmatpush.bf16.msrb.mxu0 %v3182_v34  ;;  %v3976_v34 = vld [vmem:[#allocation5 + $0x74c] sm:$0xf]  ;;  %v3118_v38 = vor.u32 %v3880_v23, %v3115_v24  ;;  %v3211_v6 = vld [vmem:[#allocation5 + $0x518] sm:$0xf0] }
 0x101   :  { %2080 = vmatpush.bf16.msrb.mxu1 %v3310_v35  ;;  %v3499_v35 = vld [vmem:[#allocation5 + $0x758] sm:$0xf0]  ;;  %v1808_v56 = vpop.f32.mrf.mxu1 }
 0x102   :  { %2094 = vmatpush.bf16.msrb.mxu2 %v3438_v36  ;;  %v4354_v36 = vld [vmem:[#allocation7] sm:$0xf]  ;;  %v3467_v13 = vld [vmem:[#allocation5 + $0x718] sm:$0xf0] }
 0x103   :  { %2108 = vmatpush.bf16.msrb.mxu3 %v3566_v41  ;;  %v3246_v41 = vor.u32 %v3912_v25, %v3243_v27  ;;  %v385_v60 = vperm.slane %v4354_v36, 0  ;;  %v386_v61 = vperm.slane %v4354_v36, 1  ;;  %v3470_v25 = vor.u32 %v3968_v12, %v3467_v13  ;;  %v1796_v27 = vpop.f32.mrf.mxu0 }
 0x104   :  { %2067 = vmatpush.bf16.msrb.mxu0 %v3166_v52  ;;  %v3502_v52 = vor.u32 %v3976_v34, %v3499_v35  ;;  %v1836_v24 = vpop.f32.mrf.mxu3  ;;  %v4005_v35 = vld [vmem:[#allocation8 + $0x30] sm:$0xff] }
 0x105   :  { %2081 = vmatpush.bf16.msrb.mxu1 %v3294_v53  ;;  %v3227_v53 = vld [vmem:[#allocation5 + $0x538] sm:$0xf0]  ;;  %v1683_v15 = vadd.f32 %v4322_v3, %v385_v60  ;;  %v1685_v16 = vadd.f32 %v4330_v45, %v385_v60 }
 0x106   :  { %2095 = vmatpush.bf16.msrb.mxu2 %v3422_v54  ;;  %v3940_v54 = vld [vmem:[#allocation5 + $0x62c] sm:$0xf]  ;;  %v3230_v17 = vor.u32 %v3908_v51, %v3227_v53 }
 0x107   :  { %2109 = vmatpush.bf16.msrb.mxu3 %v3550_v59  ;;  %v3483_v59 = vld [vmem:[#allocation5 + $0x738] sm:$0xf0]  ;;  %v3358_v63 = vor.u32 %v3940_v54, %v3355_v55  ;;  %v1697_v3 = vadd.f32 %v4324_v9, %v1683_v15  ;;  %v1699_v45 = vadd.f32 %v4332_v49, %v1685_v16  ;;  %v4012_v51 = vld [vmem:[#allocation8 + $0x68] sm:$0xff]  ;;  %v4011_v55 = vld [vmem:[#allocation8 + $0x60] sm:$0xff] }
 0x108   :  { %2068 = vmatpush.bf16.msrb.mxu0 %v3150_v10  ;;  %v3872_v10 = vld [vmem:[#allocation5 + $0x40c] sm:$0xf]  ;;  %v3486_v5 = vor.u32 %v3972_v1, %v3483_v59  ;;  %v4002_v59 = vld [vmem:[#allocation8 + $0x18] sm:$0xff] }
 0x109   :  { %2082 = vmatpush.bf16.msrb.mxu1 %v3278_v2  ;;  %v3083_v2 = vld [vmem:[#allocation5 + $0x418] sm:$0xf0]  ;;  %v1810_v31 = vpop.f32.mrf.mxu1  ;;  %v1713_v9 = vadd.f32 %v4334_v14, %v1699_v45  ;;  %v4008_v15 = vld [vmem:[#allocation8 + $0x48] sm:$0xff] }
 0x10a   :  { %2096 = vmatpush.bf16.msrb.mxu2 %v3406_v4  ;;  %v3904_v4 = vld [vmem:[#allocation5 + $0x50c] sm:$0xf]  ;;  %v3086_v19 = vor.u32 %v3872_v10, %v3083_v2  ;;  %v4022_v2 = vld [vmem:[#allocation8 + $0xb8] sm:$0xff] }
 0x10b   :  { %2110 = vmatpush.bf16.msrb.mxu3 %v3534_v11  ;;  %v3339_v11 = vld [vmem:[#allocation5 + $0x618] sm:$0xf0] }
 0x10c   :  { %2069 = vmatpush.bf16.msrb.mxu0 %v3134_v20  ;;  %v1822_v20 = vpop.f32.mrf.mxu2  ;;  %v3342_v23 = vor.u32 %v3936_v7, %v3339_v11 }
 0x10d   :  { %2083 = vmatpush.bf16.msrb.mxu1 %v3262_v21  ;;  %v1795_v21 = vadd.f32 %v1794_v46, %v386_v61  ;;  %v4004_v46 = vld [vmem:[#allocation8 + $0x28] sm:$0xff] }
 0x10e   :  { %2097 = vmatpush.bf16.msrb.mxu2 %v3390_v22  ;;  %v3214_v22 = vor.u32 %v3904_v4, %v3211_v6  ;;  %v4001_v4 = vld [vmem:[#allocation8 + $0x10] sm:$0xff] }
 0x10f   :  { %2111 = vmatpush.bf16.msrb.mxu3 %v3518_v26  ;;  %v4006_v26 = vld [vmem:[#allocation8 + $0x38] sm:$0xff]  ;;  %v1809_v34 = vadd.f32 %v1808_v56, %v1795_v21  ;;  %v4021_v6 = vld [vmem:[#allocation8 + $0xb0] sm:$0xff] }
 0x110   :  { %2070 = vmatpush.bf16.msrb.mxu0 %v3118_v38  ;;  %v1797_v38 = vadd.f32 %v1796_v27, %v386_v61 }
 0x111   :  { %2084 = vmatpush.bf16.msrb.mxu1 %v3246_v41  ;;  %v4013_v41 = vld [vmem:[#allocation8 + $0x70] sm:$0xff]  ;;  %v1823_v49 = vadd.f32 %v1822_v20, %v1809_v34 }
 0x112   :  { %2098 = vmatpush.bf16.msrb.mxu2 %v3374_v42  ;;  %v1711_v42 = vadd.f32 %v4326_v30, %v1697_v3  ;;  %v1811_v50 = vadd.f32 %v1810_v31, %v1797_v38  ;;  %v4003_v30 = vld [vmem:[#allocation8 + $0x20] sm:$0xff]  ;;  %v4020_v31 = vld [vmem:[#allocation8 + $0xa8] sm:$0xff]  ;;  %v4018_v3 = vld [vmem:[#allocation8 + $0x98] sm:$0xff]  ;;  %v387_v38 = vperm.slane %v4354_v36, 2 }
 0x113   :  { %2112 = vmatpush.bf16.msrb.mxu3 %v3502_v52  ;;  %v1837_v53 = vadd.f32 %v1836_v24, %v1823_v49  ;;  %v4017_v34 = vld [vmem:[#allocation8 + $0x90] sm:$0xff] }
 0x114   :  { %2071 = vmatpush.bf16.msrb.mxu0 %v3102_v58  ;;  %v1824_v48 = vpop.f32.mrf.mxu2  ;;  %v1725_v52 = vadd.f32 %v4328_v32, %v1711_v42  ;;  %v4010_v32 = vld [vmem:[#allocation8 + $0x58] sm:$0xff] }
 0x115   :  { %2085 = vmatpush.bf16.msrb.mxu1 %v3230_v17  ;;  %v1825_v14 = vadd.f32 %v1824_v48, %v1811_v50 }
 0x116   :  { %2099 = vmatpush.bf16.msrb.mxu2 %v3358_v63 }
 0x117   :  { %2113 = vmatpush.bf16.msrb.mxu3 %v3486_v5  ;;  %v4009_v5 = vld [vmem:[#allocation8 + $0x50] sm:$0xff] }
 0x118   :  { %2072 = vmatpush.bf16.msrb.mxu0 %v3086_v19 }
 0x119   :  { %2086 = vmatpush.bf16.msrb.mxu1 %v3214_v22  ;;  %v1864_v54 = vpop.f32.mrf.mxu1  ;;  %v3999_v22 = vld [vmem:[#allocation8] sm:$0xff] }
 0x11a   :  { %2100 = vmatpush.bf16.msrb.mxu2 %v3342_v23 }
 0x11b   :  { %2114 = vmatpush.bf16.msrb.mxu3 %v3470_v25  ;;  %2073 = vmatmul.bf16.vlgmr.msrb.gmra.mxu0 %v4294_v39  ;;  %v1838_v39 = vpop.f32.mrf.mxu3 }
 0x11c   :  { %2393 = vmatpush.bf16.msra.mxu0 %v4006_v26  ;;  %2087 = vmatmul.bf16.vlgmr.msrb.gmra.mxu1 %v4298_v44  ;;  %v1727_v44 = vadd.f32 %v4336_v18, %v1713_v9  ;;  %v1839_v60 = vadd.f32 %v1838_v39, %v1825_v14 }
 0x11d   :  { %2407 = vmatpush.bf16.msra.mxu1 %v4014_v29  ;;  %2101 = vmatmul.bf16.vlgmr.msrb.gmra.mxu2 %v4296_v43  ;;  %v1850_v43 = vpop.f32.mrf.mxu0 }
 0x11e   :  { %2115 = vmatmul.bf16.vlgmr.msrb.gmra.mxu3 %v4300_v47  ;;  %v1739_v47 = vadd.f32 %v4338_v28, %v1725_v52  ;;  %v1741_v56 = vadd.f32 %v4350_v0, %v1727_v44  ;;  %v1851_v1 = vadd.f32 %v1850_v43, %v1837_v53  ;;  %2421 = vmatpush.bf16.msra.mxu2 %v4022_v2 }
 0x120   :  { %2394 = vmatpush.bf16.msra.mxu0 %v4005_v35  ;;  %v1878_v61 = vpop.f32.mrf.mxu2  ;;  %v1753_v18 = vadd.f32 %v4340_v33, %v1739_v47  ;;  %v1755_v58 = vadd.f32 %v4352_v8, %v1741_v56  ;;  %v1865_v17 = vadd.f32 %v1864_v54, %v1851_v1  ;;  %v4000_v33 = vld [vmem:[#allocation8 + $0x8] sm:$0xff] }
 0x121   :  { %2408 = vmatpush.bf16.msra.mxu1 %v4013_v41  ;;  %v1866_v7 = vpop.f32.mrf.mxu1  ;;  %v4016_v41 = vld [vmem:[#allocation8 + $0x88] sm:$0xff] }
 0x122   :  { %v1769_v28 = vadd.f32 %v4356_v37, %v1755_v58  ;;  %v1767_v11 = vadd.f32 %v4346_v57, %v1753_v18  ;;  %v1879_v12 = vadd.f32 %v1878_v61, %v1865_v17  ;;  %2422 = vmatpush.bf16.msra.mxu2 %v4021_v6  ;;  %v4007_v57 = vld [vmem:[#allocation8 + $0x40] sm:$0xff] }
 0x123   :  { %v1892_v10 = vpop.f32.mrf.mxu3 }
 0x124   :  { %2395 = vmatpush.bf16.msra.mxu0 %v4004_v46  ;;  %v1783_v8 = vadd.f32 %v4358_v40, %v1769_v28  ;;  %v1781_v37 = vadd.f32 %v4348_v62, %v1767_v11  ;;  %v1893_v19 = vadd.f32 %v1892_v10, %v1879_v12  ;;  %v4019_v62 = vld [vmem:[#allocation8 + $0xa0] sm:$0xff]  ;;  %v4030_v10 = vld [vmem:[#allocation8 + $0xf8] sm:$0xff]  ;;  %v4028_v12 = vld [vmem:[#allocation8 + $0xe8] sm:$0xff] }
 0x125   :  { %2409 = vmatpush.bf16.msra.mxu1 %v4012_v51  ;;  %v1852_v63 = vpop.f32.mrf.mxu0  ;;  %v4015_v46 = vld [vmem:[#allocation8 + $0x80] sm:$0xff]  ;;  %2435 = vmatpush.bf16.msra.mxu3 %v4030_v10 }
 0x126   :  { %v1853_v0 = vadd.f32 %v1852_v63, %v1839_v60  ;;  %v2125_v23 = vmax.f32 %v1783_v8, 0.0  ;;  %v2121_v25 = vmax.f32 %v1781_v37, 0.0  ;;  %v2122_v26 = vmax.f32 %v1893_v19, 0.0  ;;  %2423 = vmatpush.bf16.msra.mxu2 %v4020_v31  ;;  %v4026_v8 = vld [vmem:[#allocation8 + $0xd8] sm:$0xff] }
 0x127   :  { %v388_v19 = vperm.slane %v4354_v36, 3 }
 0x128   :  { %2396 = vmatpush.bf16.msra.mxu0 %v4003_v30  ;;  %v1867_v13 = vadd.f32 %v1866_v7, %v1853_v0  ;;  %v1880_v16 = vpop.f32.mrf.mxu2  ;;  %v2129_v40 = vpack.c.bf16 %v2125_v23, %v2121_v25  ;;  %v4029_v0 = vld [vmem:[#allocation8 + $0xf0] sm:$0xff] }
 0x129   :  { %2410 = vmatpush.bf16.msra.mxu1 %v4011_v55  ;;  %2436 = vmatpush.bf16.msra.mxu3 %v4029_v0 }
 0x12a   :  { %v1881_v20 = vadd.f32 %v1880_v16, %v1867_v13  ;;  %2424 = vmatpush.bf16.msra.mxu2 %v4019_v62  ;;  %v4025_v13 = vld [vmem:[#allocation8 + $0xd0] sm:$0xff]  ;;  %v4024_v16 = vld [vmem:[#allocation8 + $0xc8] sm:$0xff] }
 0x12b   :  { %v1894_v21 = vpop.f32.mrf.mxu3 }
 0x12c   :  { %2397 = vmatpush.bf16.msra.mxu0 %v4002_v59  ;;  %v1895_v24 = vadd.f32 %v1894_v21, %v1881_v20  ;;  %v4023_v20 = vld [vmem:[#allocation8 + $0xc0] sm:$0xff] }
 0x12d   :  { %2411 = vmatpush.bf16.msra.mxu1 %v4010_v32  ;;  %2437 = vmatpush.bf16.msra.mxu3 %v4028_v12 }
 0x12e   :  { %v2126_v27 = vmax.f32 %v1895_v24, 0.0  ;;  %2425 = vmatpush.bf16.msra.mxu2 %v4018_v3 }
 0x130   :  { %2398 = vmatpush.bf16.msra.mxu0 %v4001_v4  ;;  %v2130_v29 = vpack.c.bf16 %v2126_v27, %v2122_v26 }
 0x131   :  { %2412 = vmatpush.bf16.msra.mxu1 %v4009_v5 }
 0x132   :  { %2426 = vmatpush.bf16.msra.mxu2 %v4017_v34 }
 0x134   :  { %2399 = vmatpush.bf16.msra.mxu0 %v4000_v33  ;;  %v4027_v33 = vld [vmem:[#allocation8 + $0xe0] sm:$0xff] }
 0x135   :  { %2413 = vmatpush.bf16.msra.mxu1 %v4008_v15  ;;  %2438 = vmatpush.bf16.msra.mxu3 %v4027_v33 }
 0x136   :  { %2427 = vmatpush.bf16.msra.mxu2 %v4016_v41 }
 0x138   :  { %2400 = vmatpush.bf16.msra.mxu0 %v3999_v22  ;;  %v1906_v45 = vpop.f32.mrf.mxu0 }
 0x139   :  { %2414 = vmatpush.bf16.msra.mxu1 %v4007_v57  ;;  %v1920_v35 = vpop.f32.mrf.mxu1  ;;  %v1907_v9 = vadd.f32 %v1906_v45, %v387_v38  ;;  %2439 = vmatpush.bf16.msra.mxu3 %v4026_v8 }
 0x13a   :  { %2428 = vmatpush.bf16.msra.mxu2 %v4015_v46 }
 0x13b   :  { %2401 = vmatmul.bf16.vlgmr.msra.gmra.mxu0 %v2129_v40  ;;  %v1921_v39 = vadd.f32 %v1920_v35, %v1907_v9 }
 0x13c   :  { %2415 = vmatmul.bf16.vlgmr.msra.gmra.mxu1 %v2130_v29 }
 0x13d   :  { %2440 = vmatpush.bf16.msra.mxu3 %v4025_v13 }
 0x140   :  { %v1934_v42 = vpop.f32.mrf.mxu2  ;;  %v1908_v48 = vpop.f32.mrf.mxu0 }
 0x141   :  { %v1948_v49 = vpop.f32.mrf.mxu3  ;;  %v1922_v50 = vpop.f32.mrf.mxu1  ;;  %v1909_v51 = vadd.f32 %v1908_v48, %v387_v38  ;;  %v1935_v52 = vadd.f32 %v1934_v42, %v1921_v39  ;;  %2441 = vmatpush.bf16.msra.mxu3 %v4024_v16 }
 0x143   :  { %v1923_v53 = vadd.f32 %v1922_v50, %v1909_v51  ;;  %v1949_v30 = vadd.f32 %v1948_v49, %v1935_v52 }
 0x145   :  { %2442 = vmatpush.bf16.msra.mxu3 %v4023_v20 }
 0x148   :  { %v1936_v44 = vpop.f32.mrf.mxu2 }
 0x149   :  { %v1950_v43 = vpop.f32.mrf.mxu3  ;;  %v1937_v55 = vadd.f32 %v1936_v44, %v1923_v53 }
 0x14b   :  { %v1951_v56 = vadd.f32 %v1950_v43, %v1937_v55  ;;  %v4037_v55 = vld [vmem:[#allocation10 + $0x30] sm:$0xff] }
 0x158   :  { %v1962_v54 = vpop.f32.mrf.mxu0 }
 0x159   :  { %v1976_v14 = vpop.f32.mrf.mxu1  ;;  %v1963_v47 = vadd.f32 %v1962_v54, %v1949_v30 }
 0x15b   :  { %v1977_v59 = vadd.f32 %v1976_v14, %v1963_v47  ;;  %v4038_v14 = vld [vmem:[#allocation10 + $0x38] sm:$0xff]  ;;  %v4036_v47 = vld [vmem:[#allocation10 + $0x28] sm:$0xff] }
 0x15c   :  { %2520 = vmatpush.bf16.msrb.mxu0 %v4038_v14 }
 0x160   :  { %v1990_v1 = vpop.f32.mrf.mxu2  ;;  %v1964_v60 = vpop.f32.mrf.mxu0  ;;  %2521 = vmatpush.bf16.msrb.mxu0 %v4037_v55 }
 0x161   :  { %v2004_v32 = vpop.f32.mrf.mxu3  ;;  %v1965_v61 = vadd.f32 %v1964_v60, %v1951_v56  ;;  %v1978_v18 = vpop.f32.mrf.mxu1  ;;  %v1991_v58 = vadd.f32 %v1990_v1, %v1977_v59  ;;  %v4035_v56 = vld [vmem:[#allocation10 + $0x20] sm:$0xff]  ;;  %v4034_v1 = vld [vmem:[#allocation10 + $0x18] sm:$0xff]  ;;  %v4033_v59 = vld [vmem:[#allocation10 + $0x10] sm:$0xff] }
 0x162   :  { %v4032_v60 = vld [vmem:[#allocation10 + $0x8] sm:$0xff] }
 0x163   :  { %v1979_v17 = vadd.f32 %v1978_v18, %v1965_v61  ;;  %v2005_v2 = vadd.f32 %v2004_v32, %v1991_v58  ;;  %v4031_v32 = vld [vmem:[#allocation10] sm:$0xff] }
 0x164   :  { %2522 = vmatpush.bf16.msrb.mxu0 %v4036_v47 }
 0x165   :  { %v2123_v6 = vmax.f32 %v2005_v2, 0.0 }
 0x168   :  { %v1992_v63 = vpop.f32.mrf.mxu2  ;;  %2523 = vmatpush.bf16.msrb.mxu0 %v4035_v56 }
 0x169   :  { %v1993_v4 = vadd.f32 %v1992_v63, %v1979_v17  ;;  %v2006_v28 = vpop.f32.mrf.mxu3  ;;  %v4055_v17 = vld [vmem:[%s4400_s4] ss:$0 sm:$0xff] }
 0x16b   :  { %v2007_v5 = vadd.f32 %v2006_v28, %v1993_v4 }
 0x16c   :  { %2524 = vmatpush.bf16.msrb.mxu0 %v4034_v1 }
 0x16d   :  { %v2127_v7 = vmax.f32 %v2007_v5, 0.0 }
 0x16f   :  { %v2131_v11 = vpack.c.bf16 %v2127_v7, %v2123_v6 }
 0x170   :  { %2525 = vmatpush.bf16.msrb.mxu0 %v4033_v59 }
 0x171   :  { %2429 = vmatmul.bf16.vlgmr.msra.gmra.mxu2 %v2131_v11 }
 0x174   :  { %2526 = vmatpush.bf16.msrb.mxu0 %v4032_v60 }
 0x178   :  { %v2018_v15 = vpop.f32.mrf.mxu0  ;;  %2527 = vmatpush.bf16.msrb.mxu0 %v4031_v32 }
 0x179   :  { %v2032_v37 = vpop.f32.mrf.mxu1  ;;  %v2019_v23 = vadd.f32 %v2018_v15, %v388_v19 }
 0x17b   :  { %v2033_v25 = vadd.f32 %v2032_v37, %v2019_v23 }
 0x180   :  { %v2046_v21 = vpop.f32.mrf.mxu2  ;;  %v2020_v24 = vpop.f32.mrf.mxu0 }
 0x181   :  { %v2060_v22 = vpop.f32.mrf.mxu3  ;;  %v2034_v57 = vpop.f32.mrf.mxu1  ;;  %v2021_v26 = vadd.f32 %v2020_v24, %v388_v19  ;;  %v2047_v40 = vadd.f32 %v2046_v21, %v2033_v25  ;;  %v4056_v19 = vld [vmem:[%s4402_s6] ss:$0 sm:$0xff] }
 0x183   :  { %v2035_v29 = vadd.f32 %v2034_v57, %v2021_v26  ;;  %v2061_v45 = vadd.f32 %v2060_v22, %v2047_v40 }
 0x188   :  { %v2048_v27 = vpop.f32.mrf.mxu2 }
 0x189   :  { %v2062_v31 = vpop.f32.mrf.mxu3  ;;  %v2049_v34 = vadd.f32 %v2048_v27, %v2035_v29 }
 0x18b   :  { %v2063_v36 = vadd.f32 %v2062_v31, %v2049_v34 }
 0x198   :  { %v2074_v62 = vpop.f32.mrf.mxu0 }
 0x199   :  { %v2088_v3 = vpop.f32.mrf.mxu1  ;;  %v2075_v35 = vadd.f32 %v2074_v62, %v2061_v45 }
 0x19b   :  { %v2089_v9 = vadd.f32 %v2088_v3, %v2075_v35 }
 0x1a0   :  { %v2102_v38 = vpop.f32.mrf.mxu2  ;;  %v2076_v42 = vpop.f32.mrf.mxu0 }
 0x1a1   :  { %v2116_v41 = vpop.f32.mrf.mxu3  ;;  %v2077_v49 = vadd.f32 %v2076_v42, %v2063_v36  ;;  %v2103_v46 = vadd.f32 %v2102_v38, %v2089_v9  ;;  %v2090_v48 = vpop.f32.mrf.mxu1 }
 0x1a3   :  { %v2091_v50 = vadd.f32 %v2090_v48, %v2077_v49  ;;  %v2117_v51 = vadd.f32 %v2116_v41, %v2103_v46 }
 0x1a5   :  { %v2124_v43 = vmax.f32 %v2117_v51, 0.0 }
 0x1a8   :  { %v2104_v39 = vpop.f32.mrf.mxu2 }
 0x1a9   :  { %v2105_v52 = vadd.f32 %v2104_v39, %v2091_v50  ;;  %v2118_v44 = vpop.f32.mrf.mxu3 }
 0x1ab   :  { %v2119_v53 = vadd.f32 %v2118_v44, %v2105_v52 }
 0x1ad   :  { %v2128_v30 = vmax.f32 %v2119_v53, 0.0 }
 0x1af   :  { %v2132_v54 = vpack.c.bf16 %v2128_v30, %v2124_v43 }
 0x1b1   :  { %2443 = vmatmul.bf16.vlgmr.msra.gmra.mxu3 %v2132_v54 }
 0x1b8   :  { %v2402_v61 = vpop.f32.mrf.mxu0 }
 0x1b9   :  { %v2416_v18 = vpop.f32.mrf.mxu1  ;;  %v2403_v10 = vadd.f32 %v4055_v17, %v2402_v61 }
 0x1bb   :  { %v2417_v0 = vadd.f32 %v2416_v18, %v2403_v10 }
 0x1c0   :  { %v2404_v63 = vpop.f32.mrf.mxu0 }
 0x1c1   :  { %v2405_v4 = vadd.f32 %v4055_v17, %v2404_v63  ;;  %v2418_v28 = vpop.f32.mrf.mxu1 }
 0x1c3   :  { %v2419_v6 = vadd.f32 %v2418_v28, %v2405_v4 }
 0x1f4   :  { %v2430_v58 = vpop.f32.mrf.mxu2 }
 0x1f5   :  { %v2431_v7 = vadd.f32 %v2430_v58, %v2417_v0 }
 0x1fc   :  { %v2432_v5 = vpop.f32.mrf.mxu2 }
 0x1fd   :  { %v2433_v11 = vadd.f32 %v2432_v5, %v2419_v6 }
 0x234   :  { %v2444_v2 = vpop.f32.mrf.mxu3 }
 0x235   :  { %v2445_v12 = vadd.f32 %v2444_v2, %v2431_v7 }
 0x237   :  { %v2449_v13 = vmax.f32 %v2445_v12, 0.0 }
 0x23c   :  { %v2446_v33 = vpop.f32.mrf.mxu3 }
 0x23d   :  { %v2447_v8 = vadd.f32 %v2446_v33, %v2433_v11 }
 0x23f   :  { %v2450_v15 = vmax.f32 %v2447_v8, 0.0 }
 0x241   :  { %v2451_v16 = vpack.c.bf16 %v2450_v15, %v2449_v13 }
 0x243   :  { %2528 = vmatmul.bf16.vlgmr.msrb.gmra.mxu0 %v2451_v16 }
 0x2c0   :  { %v2529_v37 = vpop.f32.mrf.mxu0 }
 0x2c1   :  { %v2530_v21 = vadd.f32 %v4056_v19, %v2529_v37 }
 0x2c8   :  { %v2531_v20 = vpop.f32.mrf.mxu0 }
 0x2c9   :  { %v2532_v22 = vadd.f32 %v4056_v19, %v2531_v20 }
 0x2cb   :  { %v4042_v23 = vpack.c.bf16 %v2532_v22, %v2530_v21 }
 0x2cd   :  { %4043 = vst [vmem:[#allocation11] sm:$0xff] %v4042_v23  }
 0x2ce   :  { %2550 = dma.vmem_to_hbm [thread:$0]  %s2543_s30, 128, %s2545_s10, [#allocation4], %s4213_s13, %s4213_s13, %s4214_s14  }
 0x2cf   :  { %4207 = dma.done.wait [#allocation4], 128  }
 0x2d0   :  { %4208 = vsyncadd [#allocation4], 4294967168 }
 0x2d1   :  { %2555 = vsyncpa [#allocation3], 1 }
 0x2d2   :  { %2556 = vsyncpa [#allocation6], 1 }
 0x2d3   :  { %2557 = vsyncpa [#allocation9], 1 }
 0x2d4   :  { %2558 = vsyncpa [#allocation4], 1 }

</bundles_post_ra>
